<compile_context>
chip_gen: v7x
topology: tpu7x:2x2x1
jax: 0.10.0
libtpu: 0.0.40
codegen_flags: <defaults>
</compile_context>

<pallas_src>
import math

import numpy as np
import jax
import jax.numpy as jnp
from jax import lax
from jax.experimental import pallas as pl
from jax.experimental.pallas import tpu as pltpu

PI = 3.1415926        # same hard-coded constant as scheduler/BaGTI/src/npn.py
UCB_K = 0.5           # TODO(synk): synthetic stand-in for the value in src/constants.py

K1_RAW = 50 * 54      # 2700 input features (hard-coded by the module)
K1_PAD = 2816         # padded to a multiple of 256 for clean MXU K-tiling
EPS_VAR = 1e-6        # clamp on o_s before rsqrt (reference uses sqrt(0)=0; avoids 0*inf)


# ----------------------------- in-kernel NPN math ----------------------------------------

def _sigmoid_k(t):
    # 1 / (1 + exp(-t)) with the reciprocal on the EUP slot.
    return pl.reciprocal(1.0 + jnp.exp(-t), approx=True)


def _npn_relu_k(o_m, o_s):
    """NPNRelu: closed-form moments of max(0, N(o_m, o_s)) with probit~sigmoid approx."""
    o_s = jnp.maximum(o_s, EPS_VAR)
    scale = math.sqrt(8.0 / PI)
    inv_sqrt = lax.rsqrt(o_s)                      # EUP
    sqrt_s = o_s * inv_sqrt
    gate = _sigmoid_k(scale * o_m * inv_sqrt)
    pdf = sqrt_s * (1.0 / math.sqrt(2.0 * PI)) * jnp.exp(
        -0.5 * (o_m * o_m) * (inv_sqrt * inv_sqrt))
    a_m = gate * o_m + pdf
    a_s = gate * (o_m * o_m + o_s) + o_m * pdf - a_m * a_m
    return a_m, a_s


def _npn_sigmoid_k(o_m, o_s):
    """NPNSigmoid: moment-matched sigmoid of a Gaussian."""
    xi_sq = PI / 8.0
    alpha = 4.0 - 2.0 * math.sqrt(2.0)
    beta = -math.log(math.sqrt(2.0) + 1.0)
    a_m = _sigmoid_k(o_m * lax.rsqrt(1.0 + xi_sq * o_s))
    a_s = _sigmoid_k(alpha * (o_m + beta)
                     * lax.rsqrt(1.0 + xi_sq * alpha * alpha * o_s)) - a_m * a_m
    return a_m, a_s


# ----------------------------------- Pallas kernel --------------------------------------

def npn_mlp_kernel(x_ref, w1m_ref, w1v_ref, w23_ref, misc_ref, out_ref):
    # misc slab layout (f32, (16, 128)):
    #   row 0: b1_m   row 1: b1_s   row 2: b2_m   row 3: b2_s
    #   row 4: b3_m[:64]   row 5: b3_s[:64]
    #   row 6: w4_m[:64]   row 7: w4_a[:64]   row 8: w4_s[:64]
    #   row 9: [b4_m, b4_s, 0, ...]
    misc = misc_ref[...]
    b1m = misc[0:1, :]
    b1s = misc[1:2, :]
    b2m = misc[2:3, :]
    b2s = misc[3:4, :]
    b3m = misc[4:5, 0:64]
    b3s = misc[5:6, 0:64]
    w4m = misc[6:7, 0:64]
    w4a = misc[7:8, 0:64]
    w4s = misc[8:9, 0:64]
    b4m = misc[9:10, 0:1]
    b4s = misc[9:10, 1:2]

    x = x_ref[...]                               # (Bp, 2816) f32
    x_bf = x.astype(jnp.bfloat16)
    xsq_bf = (x * x).astype(jnp.bfloat16)        # NPNLinear(dual_input=False): x_s = x*x

    # ---- layer 1: variance path is a single matmul with pre-folded
    #      w1v = 2*softplus(W_s_) + W_m^2 (offline, bf16) ----
    m = jnp.dot(x_bf, w1m_ref[...], preferred_element_type=jnp.float32) + b1m
    s = jnp.dot(xsq_bf, w1v_ref[...], preferred_element_type=jnp.float32) + b1s
    m, s = _npn_relu_k(m, s)

    # w23 slab layout (bf16, (384, 256)):
    #   rows   0:128 -> mean weights   (cols 0:128 layer 2, cols 128:192 layer 3)
    #   rows 128:384 -> fused variance weights vstack(W_a, W_s) (same column split)

    # ---- layer 2: fused variance matmul: concat(x_s, x_m^2) @ vstack(W_a, W_s) ----
    lhs_m = m.astype(jnp.bfloat16)
    lhs_v = jnp.concatenate([s, m * m], axis=-1).astype(jnp.bfloat16)   # (Bp, 256)
    m2 = jnp.dot(lhs_m, w23_ref[0:128, 0:128], preferred_element_type=jnp.float32) + b2m
    s2 = jnp.dot(lhs_v, w23_ref[128:384, 0:128], preferred_element_type=jnp.float32) + b2s
    m, s = _npn_relu_k(m2, s2)

    # ---- layer 3 (output width 64, stored in cols 128:192; cols 192:256 are zero pad) ----
    lhs_m = m.astype(jnp.bfloat16)
    lhs_v = jnp.concatenate([s, m * m], axis=-1).astype(jnp.bfloat16)   # (Bp, 256)
    m3 = jnp.dot(lhs_m, w23_ref[0:128, 128:256],
                 preferred_element_type=jnp.float32)[:, 0:64] + b3m
    s3 = jnp.dot(lhs_v, w23_ref[128:384, 128:256],
                 preferred_element_type=jnp.float32)[:, 0:64] + b3s
    m, s = _npn_relu_k(m3, s3)

    # ---- layer 4 (64 -> 1): VPU multiply + lane reduction instead of N=1 MXU matmuls ----
    o4m = jnp.sum(m * w4m, axis=-1, keepdims=True) + b4m
    o4s = jnp.sum(s * w4a + (m * m) * w4s, axis=-1, keepdims=True) + b4s
    a_m, a_s = _npn_sigmoid_k(o4m, o4s)

    out_ref[...] = a_m + UCB_K * a_s             # inference branch of forward()


# ----------------------------------- wrapper ---------------------------------------------

def prepare_params(params):
    """Offline weight prep: softplus + algebraic folds, slab packing, bf16 cast, K padding."""
    p1, p2, p3, p4 = params

    # layer 1 (dual_input=False): o_s = x^2 @ (2*softplus(W_s_) + W_m^2) + softplus(b_s_)
    w1m = p1["w_m"]
    w1s = jax.nn.softplus(p1["w_s_"])
    w1v = 2.0 * w1s + w1m * w1m
    pad = K1_PAD - w1m.shape[0]
    w1m_p = jnp.pad(w1m, ((0, pad), (0, 0))).astype(jnp.bfloat16)
    w1v_p = jnp.pad(w1v, ((0, pad), (0, 0))).astype(jnp.bfloat16)

    def fold(p):
        # o_s = x_s @ (W_s + W_m^2) + x_m^2 @ W_s  ->  concat(x_s, x_m^2) @ vstack(W_a, W_s)
        wm = p["w_m"]
        ws = jax.nn.softplus(p["w_s_"])
        wa = ws + wm * wm
        wv = jnp.concatenate([wa, ws], axis=0)          # (2K, N)
        return wm, wv, p["b_m"].reshape(-1), jax.nn.softplus(p["b_s_"]).reshape(-1)

    w2m, w2v, b2m, b2s = fold(p2)                       # (128,128), (256,128)
    w3m, w3v, b3m, b3s = fold(p3)                       # (128, 64), (256, 64)
    w4m, w4v, b4m, b4s = fold(p4)                       # ( 64,  1), (128,  1)

    # packed layers-2/3 slab (384, 256) bf16
    w23 = jnp.zeros((384, 256), jnp.float32)
    w23 = w23.at[0:128, 0:128].set(w2m)
    w23 = w23.at[128:384, 0:128].set(w2v)
    w23 = w23.at[0:128, 128:192].set(w3m)
    w23 = w23.at[128:384, 128:192].set(w3v)
    w23 = w23.astype(jnp.bfloat16)

    # misc f32 slab: all biases + layer-4 weight rows
    misc = jnp.zeros((16, 128), jnp.float32)
    misc = misc.at[0, :].set(p1["b_m"].reshape(-1))
    misc = misc.at[1, :].set(jax.nn.softplus(p1["b_s_"]).reshape(-1))
    misc = misc.at[2, :].set(b2m)
    misc = misc.at[3, :].set(b2s)
    misc = misc.at[4, 0:64].set(b3m)
    misc = misc.at[5, 0:64].set(b3s)
    misc = misc.at[6, 0:64].set(w4m[:, 0])              # W_m
    misc = misc.at[7, 0:64].set(w4v[0:64, 0])           # W_a = softplus(W_s_) + W_m^2
    misc = misc.at[8, 0:64].set(w4v[64:128, 0])         # W_s = softplus(W_s_)
    misc = misc.at[9, 0].set(b4m[0])
    misc = misc.at[9, 1].set(b4s[0])

    return dict(w1m=w1m_p, w1v=w1v_p, w23=w23, misc=misc)


def _round_up(n, m):
    return ((n + m - 1) // m) * m


def npn_forward_batched(x_batch, prepared):
    """Evaluate B candidates per pallas_call. x_batch: (B, 2700) or (B, 50, 54) -> (B, 1)."""
    B = x_batch.shape[0]
    x_flat = x_batch.reshape(B, -1).astype(jnp.float32)
    assert x_flat.shape[1] == K1_RAW, x_flat.shape
    Bp = max(8, _round_up(B, 8))                         # sublane-friendly batch
    x_pad = jnp.zeros((Bp, K1_PAD), jnp.float32).at[:B, :K1_RAW].set(x_flat)

    out = pl.pallas_call(
        npn_mlp_kernel,
        out_shape=jax.ShapeDtypeStruct((Bp, 1), jnp.float32),
        in_specs=[pl.BlockSpec(memory_space=pltpu.MemorySpace.VMEM)] * 5,
        out_specs=pl.BlockSpec(memory_space=pltpu.MemorySpace.VMEM),
        compiler_params=pltpu.CompilerParams(vmem_limit_bytes=16 << 20),
    )(x_pad, prepared["w1m"], prepared["w1v"], prepared["w23"], prepared["misc"])
    return out[:B]


def stochastic_energy_latency2_50_forward(x, prepared):
    """Module-exact semantics: x = x.reshape(1, -1); return m + UCB_K * s."""
    return npn_forward_batched(x.reshape(1, -1), prepared)


# -------------------------------- params / reference -------------------------------------

def init_params(key):
    """Deterministic synthetic init matching NPNLinear parameter shapes."""
    sizes = [(K1_RAW, 128), (128, 128), (128, 64), (64, 1)]
    params = []
    for fan_in, fan_out in sizes:
        key, k1, k2, k3 = jax.random.split(key, 4)
        bound = 2.0 * math.sqrt(6.0) / math.sqrt(fan_in + fan_out)
        w_m = bound * (jax.random.uniform(k1, (fan_in, fan_out), jnp.float32) - 0.5)
        # inverse-softplus of small positive values (so W_s = softplus(W_s_) is small > 0)
        w_s_ = jnp.log(jnp.expm1(0.01 + 0.1 * jax.random.uniform(k2, (fan_in, fan_out),
                                                                 jnp.float32)))
        b_m = jnp.zeros((1, fan_out), jnp.float32)
        b_s_ = jnp.log(jnp.expm1(0.01 + 0.1 * jax.random.uniform(k3, (1, fan_out),
                                                                 jnp.float32)))
        params.append(dict(w_m=w_m, w_s_=w_s_, b_m=b_m, b_s_=b_s_))
    return params


def reference_forward(x, params):
    """Pure-JAX f32 reference of the original (un-folded) forward pass."""
    x_m = x.reshape(1, -1).astype(jnp.float32)
    m, s = x_m, x_m * x_m
    for i, p in enumerate(params):
        w_s = jax.nn.softplus(p["w_s_"])
        b_s = jax.nn.softplus(p["b_s_"])
        o_m = jnp.dot(m, p["w_m"]) + p["b_m"]
        o_s = (jnp.dot(s, w_s) + jnp.dot(s, p["w_m"] * p["w_m"])
               + jnp.dot(m * m, w_s) + b_s)
        if i < len(params) - 1:                       # NPNRelu
            scale = math.sqrt(8.0 / PI)
            sqrt_s = jnp.sqrt(o_s)
            gate = jax.nn.sigmoid(scale * o_m / sqrt_s)
            pdf = sqrt_s / math.sqrt(2.0 * PI) * jnp.exp(-(o_m * o_m) / (2.0 * o_s))
            m = gate * o_m + pdf
            s = gate * (o_m * o_m + o_s) + o_m * pdf - m * m
        else:                                         # NPNSigmoid
            xi_sq = PI / 8.0
            alpha = 4.0 - 2.0 * math.sqrt(2.0)
            beta = -math.log(math.sqrt(2.0) + 1.0)
            a_m = jax.nn.sigmoid(o_m / jnp.sqrt(1.0 + xi_sq * o_s))
            a_s = jax.nn.sigmoid(alpha * (o_m + beta)
                                 / jnp.sqrt(1.0 + xi_sq * alpha * alpha * o_s)) - a_m * a_m
            m, s = a_m, a_s
    return m + UCB_K * s


# ------------------------------------- main -----------------------------------------------

if __name__ == "__main__":
    key = jax.random.PRNGKey(0)
    kx, kp = jax.random.split(key)

    params = init_params(kp)
    prepared = prepare_params(params)                 # one-time offline weight prep

    # Batched path: 4 candidates at the module's hard-coded (50, 54) input shape.
    B = 4
    xs = jax.random.normal(kx, (B, 50, 54), jnp.float32)

    fwd_batched = jax.jit(npn_forward_batched)
    out_b = jax.block_until_ready(fwd_batched(xs, prepared))

    # Module-exact single-candidate path (x.reshape(1, -1)).
    fwd_single = jax.jit(stochastic_energy_latency2_50_forward)
    out_1 = jax.block_until_ready(fwd_single(xs[0], prepared))

    ref_b = jnp.concatenate([reference_forward(xs[i], params) for i in range(B)], axis=0)
    np.testing.assert_allclose(np.asarray(out_b), np.asarray(ref_b), rtol=3e-2, atol=3e-2)
    np.testing.assert_allclose(np.asarray(out_1), np.asarray(ref_b[0:1]),
                               rtol=3e-2, atol=3e-2)

    print("KERNEL_OK")
</pallas_src>

<mosaic_0001>
module attributes {stable_mosaic.version = 11 : i64} {
  func.func @npn_mlp_kernel(%arg0: memref<8x2816xf32, #tpu.memory_space<vmem>>, %arg1: memref<2816x128xbf16, #tpu.memory_space<vmem>>, %arg2: memref<2816x128xbf16, #tpu.memory_space<vmem>>, %arg3: memref<384x256xbf16, #tpu.memory_space<vmem>>, %arg4: memref<16x128xf32, #tpu.memory_space<vmem>>, %arg5: memref<8x1xf32, #tpu.memory_space<vmem>>) attributes {dimension_semantics = [], scalar_prefetch = 0 : i64, scratch_operands = 0 : i64, tpu.core_type = #tpu.core_type<tc>} {
    %c0 = arith.constant 0 : index
    %c0_0 = arith.constant 0 : index
    %0 = vector.load %arg4[%c0, %c0_0] : memref<16x128xf32, #tpu.memory_space<vmem>>, vector<16x128xf32>
    %1 = vector.extract_strided_slice %0 {offsets = [0, 0], sizes = [1, 128], strides = [1, 1]} : vector<16x128xf32> to vector<1x128xf32>
    %2 = vector.extract_strided_slice %0 {offsets = [1, 0], sizes = [1, 128], strides = [1, 1]} : vector<16x128xf32> to vector<1x128xf32>
    %3 = vector.extract_strided_slice %0 {offsets = [2, 0], sizes = [1, 128], strides = [1, 1]} : vector<16x128xf32> to vector<1x128xf32>
    %4 = vector.extract_strided_slice %0 {offsets = [3, 0], sizes = [1, 128], strides = [1, 1]} : vector<16x128xf32> to vector<1x128xf32>
    %5 = vector.extract_strided_slice %0 {offsets = [4, 0], sizes = [1, 64], strides = [1, 1]} : vector<16x128xf32> to vector<1x64xf32>
    %6 = vector.extract_strided_slice %0 {offsets = [5, 0], sizes = [1, 64], strides = [1, 1]} : vector<16x128xf32> to vector<1x64xf32>
    %7 = vector.extract_strided_slice %0 {offsets = [6, 0], sizes = [1, 64], strides = [1, 1]} : vector<16x128xf32> to vector<1x64xf32>
    %8 = vector.extract_strided_slice %0 {offsets = [7, 0], sizes = [1, 64], strides = [1, 1]} : vector<16x128xf32> to vector<1x64xf32>
    %9 = vector.extract_strided_slice %0 {offsets = [8, 0], sizes = [1, 64], strides = [1, 1]} : vector<16x128xf32> to vector<1x64xf32>
    %10 = vector.extract_strided_slice %0 {offsets = [9, 0], sizes = [1, 1], strides = [1, 1]} : vector<16x128xf32> to vector<1x1xf32>
    %11 = vector.extract_strided_slice %0 {offsets = [9, 1], sizes = [1, 1], strides = [1, 1]} : vector<16x128xf32> to vector<1x1xf32>
    %c0_1 = arith.constant 0 : index
    %c0_2 = arith.constant 0 : index
    %12 = vector.load %arg0[%c0_1, %c0_2] : memref<8x2816xf32, #tpu.memory_space<vmem>>, vector<8x2816xf32>
    %13 = arith.truncf %12 : vector<8x2816xf32> to vector<8x2816xbf16>
    %14 = arith.mulf %12, %12 : vector<8x2816xf32>
    %15 = arith.truncf %14 : vector<8x2816xf32> to vector<8x2816xbf16>
    %c0_3 = arith.constant 0 : index
    %c0_4 = arith.constant 0 : index
    %16 = vector.load %arg1[%c0_3, %c0_4] : memref<2816x128xbf16, #tpu.memory_space<vmem>>, vector<2816x128xbf16>
    %cst = arith.constant dense<0.000000e+00> : vector<8x128xf32>
    %17 = tpu.matmul %13, %16, %cst {dimension_numbers = #tpu.dot_dimension_numbers<[1], [0], [0], [1], [0, 0, 1, 1], [], []>} : vector<8x2816xbf16>, vector<2816x128xbf16>, vector<8x128xf32> -> vector<8x128xf32>
    %18 = vector.broadcast %1 : vector<1x128xf32> to vector<8x128xf32>
    %19 = arith.addf %17, %18 : vector<8x128xf32>
    %c0_5 = arith.constant 0 : index
    %c0_6 = arith.constant 0 : index
    %20 = vector.load %arg2[%c0_5, %c0_6] : memref<2816x128xbf16, #tpu.memory_space<vmem>>, vector<2816x128xbf16>
    %cst_7 = arith.constant dense<0.000000e+00> : vector<8x128xf32>
    %21 = tpu.matmul %15, %20, %cst_7 {dimension_numbers = #tpu.dot_dimension_numbers<[1], [0], [0], [1], [0, 0, 1, 1], [], []>} : vector<8x2816xbf16>, vector<2816x128xbf16>, vector<8x128xf32> -> vector<8x128xf32>
    %22 = vector.broadcast %2 : vector<1x128xf32> to vector<8x128xf32>
    %23 = arith.addf %21, %22 : vector<8x128xf32>
    %cst_8 = arith.constant 9.99999997E-7 : f32
    %24 = vector.broadcast %cst_8 : f32 to vector<8x128xf32>
    %25 = arith.maximumf %23, %24 : vector<8x128xf32>
    %26 = math.rsqrt %25 : vector<8x128xf32>
    %27 = arith.mulf %25, %26 : vector<8x128xf32>
    %cst_9 = arith.constant 1.59576917 : f32
    %28 = vector.broadcast %cst_9 : f32 to vector<8x128xf32>
    %29 = arith.mulf %28, %19 : vector<8x128xf32>
    %30 = arith.mulf %29, %26 : vector<8x128xf32>
    %cst_10 = arith.constant 0.000000e+00 : f32
    %31 = vector.broadcast %cst_10 : f32 to vector<8x128xf32>
    %32 = arith.subf %31, %30 : vector<8x128xf32>
    %33 = math.exp %32 : vector<8x128xf32>
    %cst_11 = arith.constant 1.000000e+00 : f32
    %34 = vector.broadcast %cst_11 : f32 to vector<8x128xf32>
    %35 = arith.addf %34, %33 : vector<8x128xf32>
    %36 = tpu.reciprocal %35 {approx = true} : vector<8x128xf32> -> vector<8x128xf32>
    %cst_12 = arith.constant 0.398942292 : f32
    %37 = vector.broadcast %cst_12 : f32 to vector<8x128xf32>
    %38 = arith.mulf %27, %37 : vector<8x128xf32>
    %39 = arith.mulf %19, %19 : vector<8x128xf32>
    %cst_13 = arith.constant -5.000000e-01 : f32
    %40 = vector.broadcast %cst_13 : f32 to vector<8x128xf32>
    %41 = arith.mulf %40, %39 : vector<8x128xf32>
    %42 = arith.mulf %26, %26 : vector<8x128xf32>
    %43 = arith.mulf %41, %42 : vector<8x128xf32>
    %44 = math.exp %43 : vector<8x128xf32>
    %45 = arith.mulf %38, %44 : vector<8x128xf32>
    %46 = arith.mulf %36, %19 : vector<8x128xf32>
    %47 = arith.addf %46, %45 : vector<8x128xf32>
    %48 = arith.mulf %19, %19 : vector<8x128xf32>
    %49 = arith.addf %48, %25 : vector<8x128xf32>
    %50 = arith.mulf %36, %49 : vector<8x128xf32>
    %51 = arith.mulf %19, %45 : vector<8x128xf32>
    %52 = arith.addf %50, %51 : vector<8x128xf32>
    %53 = arith.mulf %47, %47 : vector<8x128xf32>
    %54 = arith.subf %52, %53 : vector<8x128xf32>
    %55 = arith.truncf %47 : vector<8x128xf32> to vector<8x128xbf16>
    %56 = arith.mulf %47, %47 : vector<8x128xf32>
    %57 = tpu.concatenate %54, %56 in 1 : vector<8x128xf32>, vector<8x128xf32> -> vector<8x256xf32>
    %58 = arith.truncf %57 : vector<8x256xf32> to vector<8x256xbf16>
    %c0_14 = arith.constant 0 : index
    %c0_15 = arith.constant 0 : index
    %59 = vector.load %arg3[%c0_14, %c0_15] : memref<384x256xbf16, #tpu.memory_space<vmem>>, vector<128x128xbf16>
    %cst_16 = arith.constant dense<0.000000e+00> : vector<8x128xf32>
    %60 = tpu.matmul %55, %59, %cst_16 {dimension_numbers = #tpu.dot_dimension_numbers<[1], [0], [0], [1], [0, 0, 1, 1], [], []>} : vector<8x128xbf16>, vector<128x128xbf16>, vector<8x128xf32> -> vector<8x128xf32>
    %61 = vector.broadcast %3 : vector<1x128xf32> to vector<8x128xf32>
    %62 = arith.addf %60, %61 : vector<8x128xf32>
    %c128 = arith.constant 128 : index
    %c0_17 = arith.constant 0 : index
    %63 = vector.load %arg3[%c128, %c0_17] : memref<384x256xbf16, #tpu.memory_space<vmem>>, vector<256x128xbf16>
    %cst_18 = arith.constant dense<0.000000e+00> : vector<8x128xf32>
    %64 = tpu.matmul %58, %63, %cst_18 {dimension_numbers = #tpu.dot_dimension_numbers<[1], [0], [0], [1], [0, 0, 1, 1], [], []>} : vector<8x256xbf16>, vector<256x128xbf16>, vector<8x128xf32> -> vector<8x128xf32>
    %65 = vector.broadcast %4 : vector<1x128xf32> to vector<8x128xf32>
    %66 = arith.addf %64, %65 : vector<8x128xf32>
    %cst_19 = arith.constant 9.99999997E-7 : f32
    %67 = vector.broadcast %cst_19 : f32 to vector<8x128xf32>
    %68 = arith.maximumf %66, %67 : vector<8x128xf32>
    %69 = math.rsqrt %68 : vector<8x128xf32>
    %70 = arith.mulf %68, %69 : vector<8x128xf32>
    %cst_20 = arith.constant 1.59576917 : f32
    %71 = vector.broadcast %cst_20 : f32 to vector<8x128xf32>
    %72 = arith.mulf %71, %62 : vector<8x128xf32>
    %73 = arith.mulf %72, %69 : vector<8x128xf32>
    %cst_21 = arith.constant 0.000000e+00 : f32
    %74 = vector.broadcast %cst_21 : f32 to vector<8x128xf32>
    %75 = arith.subf %74, %73 : vector<8x128xf32>
    %76 = math.exp %75 : vector<8x128xf32>
    %cst_22 = arith.constant 1.000000e+00 : f32
    %77 = vector.broadcast %cst_22 : f32 to vector<8x128xf32>
    %78 = arith.addf %77, %76 : vector<8x128xf32>
    %79 = tpu.reciprocal %78 {approx = true} : vector<8x128xf32> -> vector<8x128xf32>
    %cst_23 = arith.constant 0.398942292 : f32
    %80 = vector.broadcast %cst_23 : f32 to vector<8x128xf32>
    %81 = arith.mulf %70, %80 : vector<8x128xf32>
    %82 = arith.mulf %62, %62 : vector<8x128xf32>
    %cst_24 = arith.constant -5.000000e-01 : f32
    %83 = vector.broadcast %cst_24 : f32 to vector<8x128xf32>
    %84 = arith.mulf %83, %82 : vector<8x128xf32>
    %85 = arith.mulf %69, %69 : vector<8x128xf32>
    %86 = arith.mulf %84, %85 : vector<8x128xf32>
    %87 = math.exp %86 : vector<8x128xf32>
    %88 = arith.mulf %81, %87 : vector<8x128xf32>
    %89 = arith.mulf %79, %62 : vector<8x128xf32>
    %90 = arith.addf %89, %88 : vector<8x128xf32>
    %91 = arith.mulf %62, %62 : vector<8x128xf32>
    %92 = arith.addf %91, %68 : vector<8x128xf32>
    %93 = arith.mulf %79, %92 : vector<8x128xf32>
    %94 = arith.mulf %62, %88 : vector<8x128xf32>
    %95 = arith.addf %93, %94 : vector<8x128xf32>
    %96 = arith.mulf %90, %90 : vector<8x128xf32>
    %97 = arith.subf %95, %96 : vector<8x128xf32>
    %98 = arith.truncf %90 : vector<8x128xf32> to vector<8x128xbf16>
    %99 = arith.mulf %90, %90 : vector<8x128xf32>
    %100 = tpu.concatenate %97, %99 in 1 : vector<8x128xf32>, vector<8x128xf32> -> vector<8x256xf32>
    %101 = arith.truncf %100 : vector<8x256xf32> to vector<8x256xbf16>
    %c0_25 = arith.constant 0 : index
    %c128_26 = arith.constant 128 : index
    %102 = vector.load %arg3[%c0_25, %c128_26] : memref<384x256xbf16, #tpu.memory_space<vmem>>, vector<128x128xbf16>
    %cst_27 = arith.constant dense<0.000000e+00> : vector<8x128xf32>
    %103 = tpu.matmul %98, %102, %cst_27 {dimension_numbers = #tpu.dot_dimension_numbers<[1], [0], [0], [1], [0, 0, 1, 1], [], []>} : vector<8x128xbf16>, vector<128x128xbf16>, vector<8x128xf32> -> vector<8x128xf32>
    %104 = vector.extract_strided_slice %103 {offsets = [0, 0], sizes = [8, 64], strides = [1, 1]} : vector<8x128xf32> to vector<8x64xf32>
    %105 = vector.broadcast %5 : vector<1x64xf32> to vector<8x64xf32>
    %106 = arith.addf %104, %105 : vector<8x64xf32>
    %c128_28 = arith.constant 128 : index
    %c128_29 = arith.constant 128 : index
    %107 = vector.load %arg3[%c128_28, %c128_29] : memref<384x256xbf16, #tpu.memory_space<vmem>>, vector<256x128xbf16>
    %cst_30 = arith.constant dense<0.000000e+00> : vector<8x128xf32>
    %108 = tpu.matmul %101, %107, %cst_30 {dimension_numbers = #tpu.dot_dimension_numbers<[1], [0], [0], [1], [0, 0, 1, 1], [], []>} : vector<8x256xbf16>, vector<256x128xbf16>, vector<8x128xf32> -> vector<8x128xf32>
    %109 = vector.extract_strided_slice %108 {offsets = [0, 0], sizes = [8, 64], strides = [1, 1]} : vector<8x128xf32> to vector<8x64xf32>
    %110 = vector.broadcast %6 : vector<1x64xf32> to vector<8x64xf32>
    %111 = arith.addf %109, %110 : vector<8x64xf32>
    %cst_31 = arith.constant 9.99999997E-7 : f32
    %112 = vector.broadcast %cst_31 : f32 to vector<8x64xf32>
    %113 = arith.maximumf %111, %112 : vector<8x64xf32>
    %114 = math.rsqrt %113 : vector<8x64xf32>
    %115 = arith.mulf %113, %114 : vector<8x64xf32>
    %cst_32 = arith.constant 1.59576917 : f32
    %116 = vector.broadcast %cst_32 : f32 to vector<8x64xf32>
    %117 = arith.mulf %116, %106 : vector<8x64xf32>
    %118 = arith.mulf %117, %114 : vector<8x64xf32>
    %cst_33 = arith.constant 0.000000e+00 : f32
    %119 = vector.broadcast %cst_33 : f32 to vector<8x64xf32>
    %120 = arith.subf %119, %118 : vector<8x64xf32>
    %121 = math.exp %120 : vector<8x64xf32>
    %cst_34 = arith.constant 1.000000e+00 : f32
    %122 = vector.broadcast %cst_34 : f32 to vector<8x64xf32>
    %123 = arith.addf %122, %121 : vector<8x64xf32>
    %124 = tpu.reciprocal %123 {approx = true} : vector<8x64xf32> -> vector<8x64xf32>
    %cst_35 = arith.constant 0.398942292 : f32
    %125 = vector.broadcast %cst_35 : f32 to vector<8x64xf32>
    %126 = arith.mulf %115, %125 : vector<8x64xf32>
    %127 = arith.mulf %106, %106 : vector<8x64xf32>
    %cst_36 = arith.constant -5.000000e-01 : f32
    %128 = vector.broadcast %cst_36 : f32 to vector<8x64xf32>
    %129 = arith.mulf %128, %127 : vector<8x64xf32>
    %130 = arith.mulf %114, %114 : vector<8x64xf32>
    %131 = arith.mulf %129, %130 : vector<8x64xf32>
    %132 = math.exp %131 : vector<8x64xf32>
    %133 = arith.mulf %126, %132 : vector<8x64xf32>
    %134 = arith.mulf %124, %106 : vector<8x64xf32>
    %135 = arith.addf %134, %133 : vector<8x64xf32>
    %136 = arith.mulf %106, %106 : vector<8x64xf32>
    %137 = arith.addf %136, %113 : vector<8x64xf32>
    %138 = arith.mulf %124, %137 : vector<8x64xf32>
    %139 = arith.mulf %106, %133 : vector<8x64xf32>
    %140 = arith.addf %138, %139 : vector<8x64xf32>
    %141 = arith.mulf %135, %135 : vector<8x64xf32>
    %142 = arith.subf %140, %141 : vector<8x64xf32>
    %143 = vector.broadcast %7 : vector<1x64xf32> to vector<8x64xf32>
    %144 = arith.mulf %135, %143 : vector<8x64xf32>
    %cst_37 = arith.constant dense<0.000000e+00> : vector<8xf32>
    %145 = vector.multi_reduction <add>, %144, %cst_37 [1] : vector<8x64xf32> to vector<8xf32>
    %146 = vector.shape_cast %145 : vector<8xf32> to vector<8x1xf32>
    %147 = vector.broadcast %10 : vector<1x1xf32> to vector<8x1xf32>
    %148 = arith.addf %146, %147 : vector<8x1xf32>
    %149 = vector.broadcast %8 : vector<1x64xf32> to vector<8x64xf32>
    %150 = arith.mulf %142, %149 : vector<8x64xf32>
    %151 = arith.mulf %135, %135 : vector<8x64xf32>
    %152 = vector.broadcast %9 : vector<1x64xf32> to vector<8x64xf32>
    %153 = arith.mulf %151, %152 : vector<8x64xf32>
    %154 = arith.addf %150, %153 : vector<8x64xf32>
    %cst_38 = arith.constant dense<0.000000e+00> : vector<8xf32>
    %155 = vector.multi_reduction <add>, %154, %cst_38 [1] : vector<8x64xf32> to vector<8xf32>
    %156 = vector.shape_cast %155 : vector<8xf32> to vector<8x1xf32>
    %157 = vector.broadcast %11 : vector<1x1xf32> to vector<8x1xf32>
    %158 = arith.addf %156, %157 : vector<8x1xf32>
    %cst_39 = arith.constant 0.392699063 : f32
    %159 = vector.broadcast %cst_39 : f32 to vector<8x1xf32>
    %160 = arith.mulf %159, %158 : vector<8x1xf32>
    %cst_40 = arith.constant 1.000000e+00 : f32
    %161 = vector.broadcast %cst_40 : f32 to vector<8x1xf32>
    %162 = arith.addf %161, %160 : vector<8x1xf32>
    %163 = math.rsqrt %162 : vector<8x1xf32>
    %164 = arith.mulf %148, %163 : vector<8x1xf32>
    %cst_41 = arith.constant 0.000000e+00 : f32
    %165 = vector.broadcast %cst_41 : f32 to vector<8x1xf32>
    %166 = arith.subf %165, %164 : vector<8x1xf32>
    %167 = math.exp %166 : vector<8x1xf32>
    %cst_42 = arith.constant 1.000000e+00 : f32
    %168 = vector.broadcast %cst_42 : f32 to vector<8x1xf32>
    %169 = arith.addf %168, %167 : vector<8x1xf32>
    %170 = tpu.reciprocal %169 {approx = true} : vector<8x1xf32> -> vector<8x1xf32>
    %cst_43 = arith.constant -0.881373584 : f32
    %171 = vector.broadcast %cst_43 : f32 to vector<8x1xf32>
    %172 = arith.addf %148, %171 : vector<8x1xf32>
    %cst_44 = arith.constant 1.17157292 : f32
    %173 = vector.broadcast %cst_44 : f32 to vector<8x1xf32>
    %174 = arith.mulf %173, %172 : vector<8x1xf32>
    %cst_45 = arith.constant 0.539012074 : f32
    %175 = vector.broadcast %cst_45 : f32 to vector<8x1xf32>
    %176 = arith.mulf %175, %158 : vector<8x1xf32>
    %cst_46 = arith.constant 1.000000e+00 : f32
    %177 = vector.broadcast %cst_46 : f32 to vector<8x1xf32>
    %178 = arith.addf %177, %176 : vector<8x1xf32>
    %179 = math.rsqrt %178 : vector<8x1xf32>
    %180 = arith.mulf %174, %179 : vector<8x1xf32>
    %cst_47 = arith.constant 0.000000e+00 : f32
    %181 = vector.broadcast %cst_47 : f32 to vector<8x1xf32>
    %182 = arith.subf %181, %180 : vector<8x1xf32>
    %183 = math.exp %182 : vector<8x1xf32>
    %cst_48 = arith.constant 1.000000e+00 : f32
    %184 = vector.broadcast %cst_48 : f32 to vector<8x1xf32>
    %185 = arith.addf %184, %183 : vector<8x1xf32>
    %186 = tpu.reciprocal %185 {approx = true} : vector<8x1xf32> -> vector<8x1xf32>
    %187 = arith.mulf %170, %170 : vector<8x1xf32>
    %188 = arith.subf %186, %187 : vector<8x1xf32>
    %cst_49 = arith.constant 5.000000e-01 : f32
    %189 = vector.broadcast %cst_49 : f32 to vector<8x1xf32>
    %190 = arith.mulf %189, %188 : vector<8x1xf32>
    %191 = arith.addf %170, %190 : vector<8x1xf32>
    %c0_50 = arith.constant 0 : index
    %c0_51 = arith.constant 0 : index
    %192 = vector.load %arg5[%c0_50, %c0_51] : memref<8x1xf32, #tpu.memory_space<vmem>>, vector<8x1xf32>
    tpu.vector_store %arg5[%c0_50, %c0_51], %191 {strides = array<i32>} : memref<8x1xf32, #tpu.memory_space<vmem>>, vector<8x1xf32>,
    return
  }
}

</mosaic_0001>

<bundles_post_ra>
// kernel: npn_forward_batched.1
= control target key start
LH: loop header
LB: loop body
LE: loop exit
PB: predicated region body
PF: predicated region fallthrough
CT: control target
= control target key end

     0   :  { %10 = vsyncpa [#allocation3], 0  ;;  %s6470_s0 = inlined_call_operand.vmem [shape: f32[8,2816], index: 0, kind: input, shape index: {}]   ;;  %s6471_s1 = inlined_call_operand.hbm [shape: bf16[2816,128], index: 1, kind: input, shape index: {}]   ;;  %s6472_s2 = inlined_call_operand.hbm [shape: bf16[2816,128], index: 2, kind: input, shape index: {}]   ;;  %s6473_s3 = inlined_call_operand.vmem [shape: bf16[384,256], index: 3, kind: input, shape index: {}]   ;;  %s6474_s4 = inlined_call_operand.vmem [shape: f32[16,128], index: 4, kind: input, shape index: {}]   ;;  %s6475_s5 = inlined_call_operand.vmem [shape: f32[8,1], index: 5, kind: output, shape index: {}]  }
   0x1   :  { %11 = vsyncpa [#allocation5], 0  ;;  %s6058_s18 = smov [#allocation2]   ;;  %s6010_s22 = scalar_lea.hbm %s6471_s1, 22528 }
   0x2   :  { %s19_s19 = sshll.u32 %s6058_s18, 4  ;;  %p6011_p0 = scmp.ne.s32.totalorder %s6471_s1, %s6010_s22  ;;  %s20_s19 = int_to_ptr.vmem [resolvable:$true] %s19_s19 }
   0x3   :  { %p6014_p1 = scmp.lt.u32.totalorder %s6010_s22, %s6471_s1 }
   0x5   :  { %p6016_p2 = pnand %p6014_p1, %p6011_p0 }
   0x7   :  { %6019 = shalt.err (!%p6016_p2)
}
   0x8   :  { %s6020_s27 = scalar_lea.vmem %s20_s19, 22528  ;;  %p6025_p4 = scmp.lt.s32.totalorder %s20_s19, %s20_s19 }
   0x9   :  { %p6021_p3 = scmp.ne.s32.totalorder %s20_s19, %s6020_s27  ;;  %p6026_p5 = scmp.lt.s32.totalorder %s6020_s27, %s6020_s27 }
   0xb   :  { %p6027_p6 = por %p6026_p5, %p6025_p4 }
   0xd   :  { %p6028_p7 = pnand %p6027_p6, %p6021_p3 }
   0xf   :  { %6031 = shalt.err (!%p6028_p7)
}
  0x10   :  { %s6059_s28 = smov 64   ;;  %s6060_s29 = smov 4  }
  0x11   :  { %25 = dma.hbm_to_vmem [thread:$0]  %s6471_s1, 22528, %s20_s19, [#allocation3], %s6059_s28, %s6059_s28, %s6060_s29  }
  0x12   :  { %s6061_s7 = smov [#allocation4]   ;;  %s6032_s11 = scalar_lea.hbm %s6472_s2, 22528 }
  0x13   :  { %s31_s8 = sshll.u32 %s6061_s7, 4  ;;  %p6033_p8 = scmp.ne.s32.totalorder %s6472_s2, %s6032_s11  ;;  %s32_s8 = int_to_ptr.vmem [resolvable:$true] %s31_s8 }
  0x14   :  { %p6036_p9 = scmp.lt.u32.totalorder %s6032_s11, %s6472_s2 }
  0x16   :  { %p6038_p10 = pnand %p6036_p9, %p6033_p8 }
  0x18   :  { %6041 = shalt.err (!%p6038_p10)
}
  0x19   :  { %s6042_s16 = scalar_lea.vmem %s32_s8, 22528  ;;  %p6047_p12 = scmp.lt.s32.totalorder %s32_s8, %s32_s8 }
  0x1a   :  { %p6043_p11 = scmp.ne.s32.totalorder %s32_s8, %s6042_s16  ;;  %p6048_p13 = scmp.lt.s32.totalorder %s6042_s16, %s6042_s16 }
  0x1c   :  { %p6049_p0 = por %p6048_p13, %p6047_p12 }
  0x1e   :  { %p6050_p1 = pnand %p6049_p0, %p6043_p11 }
  0x20   :  { %6053 = shalt.err (!%p6050_p1)
}
  0x21   :  { %37 = dma.hbm_to_vmem [thread:$0]  %s6472_s2, 22528, %s32_s8, [#allocation5], %s6059_s28, %s6059_s28, %s6060_s29  }
  0x22   :  { %6054 = dma.done.wait [#allocation3], 22528  }
  0x23   :  { %6055 = vsyncadd [#allocation3], 4294944768 }
  0x24   :  { %6056 = dma.done.wait [#allocation5], 22528  }
  0x25   :  { %6057 = vsyncadd [#allocation5], 4294944768  ;;  %v5551_v0 = vld [vmem:[#allocation2 + $0x40] sm:$0xff]   ;;  %v5555_v4 = vld [vmem:[#allocation2 + $0x48] sm:$0xff]   ;;  %vm6063_vm0 = vmmov 0   ;;  %vm4494_vm1 = vcmask 523264  }
  0x26   :  { %v5552_v1 = vld [vmem:[#allocation2 + $0xc0] sm:$0xff]   ;;  %4958 = vmatprep.subr.bf16.mxu0 %v5551_v0  ;;  %v5556_v5 = vld [vmem:[#allocation2 + $0xc8] sm:$0xff]   ;;  %v5559_v8 = vld [vmem:[#allocation2 + $0x50] sm:$0xff]   ;;  %vm4550_vm2 = vcmask 7168  }
  0x27   :  { %v5553_v2 = vld [vmem:[#allocation2] sm:$0xff]   ;;  %4980 = vmatprep.subr.bf16.mxu1 %v5552_v1  ;;  %v5557_v6 = vld [vmem:[#allocation2 + $0x8] sm:$0xff]   ;;  %v5560_v9 = vld [vmem:[#allocation2 + $0xd0] sm:$0xff]  }
  0x28   :  { %v5554_v3 = vld [vmem:[#allocation2 + $0x80] sm:$0xff]   ;;  %4959 = vmatpush3.bf16.msra.mxu0 %v5553_v2  ;;  %v5558_v7 = vld [vmem:[#allocation2 + $0x88] sm:$0xff]   ;;  %v5561_v10 = vld [vmem:[#allocation2 + $0x10] sm:$0xff]  }
  0x29   :  { %4981 = vmatpush3.bf16.msra.mxu1 %v5554_v3  ;;  %4960 = vmatprep.subr.bf16.mxu0 %v5555_v4  ;;  %v5562_v11 = vld [vmem:[#allocation2 + $0x90] sm:$0xff]   ;;  %v5563_v12 = vld [vmem:[#allocation2 + $0x58] sm:$0xff]   ;;  %v5567_v16 = vld [vmem:[#allocation2 + $0x60] sm:$0xff]  }
  0x2a   :  { %4982 = vmatprep.subr.bf16.mxu1 %v5556_v5  ;;  %v5564_v13 = vld [vmem:[#allocation2 + $0xd8] sm:$0xff]   ;;  %v5568_v17 = vld [vmem:[#allocation2 + $0xe0] sm:$0xff]   ;;  %v5571_v20 = vld [vmem:[#allocation2 + $0x68] sm:$0xff]  }
  0x2b   :  { %v5565_v14 = vld [vmem:[#allocation2 + $0x18] sm:$0xff]   ;;  %v5569_v18 = vld [vmem:[#allocation2 + $0x20] sm:$0xff]   ;;  %v5572_v21 = vld [vmem:[#allocation2 + $0xe8] sm:$0xff]  }
  0x2c   :  { %4961 = vmatpush3.bf16.msra.mxu0 %v5557_v6  ;;  %v5566_v15 = vld [vmem:[#allocation2 + $0x98] sm:$0xff]   ;;  %v5570_v19 = vld [vmem:[#allocation2 + $0xa0] sm:$0xff]   ;;  %v5573_v22 = vld [vmem:[#allocation2 + $0x28] sm:$0xff]  }
  0x2d   :  { %4983 = vmatpush3.bf16.msra.mxu1 %v5558_v7  ;;  %4962 = vmatprep.subr.bf16.mxu0 %v5559_v8  ;;  %v5574_v23 = vld [vmem:[#allocation2 + $0xa8] sm:$0xff]   ;;  %v5575_v24 = vld [vmem:[#allocation2 + $0x70] sm:$0xff]   ;;  %v5579_v28 = vld [vmem:[#allocation2 + $0x78] sm:$0xff]  }
  0x2e   :  { %4984 = vmatprep.subr.bf16.mxu1 %v5560_v9  ;;  %v5576_v25 = vld [vmem:[#allocation2 + $0xf0] sm:$0xff]   ;;  %v5580_v29 = vld [vmem:[#allocation2 + $0xf8] sm:$0xff]   ;;  %v52_v32 = vld [vmem:[%s6470_s0 + $0x8] sm:$0xff] }
  0x2f   :  { %v5577_v26 = vld [vmem:[#allocation2 + $0x30] sm:$0xff]   ;;  %v5581_v30 = vld [vmem:[#allocation2 + $0x38] sm:$0xff]   ;;  %v51_v34 = vld [vmem:[%s6470_s0] sm:$0xff]  ;;  %v74_v35 = vpack.c.bf16 %v52_v32, %v52_v32 }
  0x30   :  { %4963 = vmatpush3.bf16.msra.mxu0 %v5561_v10  ;;  %v5578_v27 = vld [vmem:[#allocation2 + $0xb0] sm:$0xff]   ;;  %v5582_v31 = vld [vmem:[#allocation2 + $0xb8] sm:$0xff]   ;;  %v73_v38 = vpack.c.bf16 %v51_v34, %v51_v34  ;;  %v5583_v40 = vld [vmem:[#allocation2 + $0x140] sm:$0xff]  }
  0x31   :  { %4985 = vmatpush3.bf16.msra.mxu1 %v5562_v11  ;;  %4964 = vmatprep.subr.bf16.mxu0 %v5563_v12  ;;  %v54_v33 = vld [vmem:[%s6470_s0 + $0x18] sm:$0xff]  ;;  %v53_v37 = vld [vmem:[%s6470_s0 + $0x10] sm:$0xff]  ;;  %v5584_v41 = vld [vmem:[#allocation2 + $0x1c0] sm:$0xff]  }
  0x32   :  { %4986 = vmatprep.subr.bf16.mxu1 %v5564_v13  ;;  %v76_v36 = vpack.c.bf16 %v54_v33, %v54_v33  ;;  %v75_v39 = vpack.c.bf16 %v53_v37, %v53_v37  ;;  %1583 = vmatprep.mubr.bf16.mxu0 %v74_v35  ;;  %v5585_v42 = vld [vmem:[#allocation2 + $0x100] sm:$0xff]   ;;  %v5587_v44 = vld [vmem:[#allocation2 + $0x148] sm:$0xff]   ;;  %v5591_v48 = vld [vmem:[#allocation2 + $0x150] sm:$0xff]  }
  0x33   :  { %v5586_v43 = vld [vmem:[#allocation2 + $0x180] sm:$0xff]   ;;  %v5588_v45 = vld [vmem:[#allocation2 + $0x1c8] sm:$0xff]   ;;  %v5592_v49 = vld [vmem:[#allocation2 + $0x1d0] sm:$0xff]  }
  0x34   :  { %4965 = vmatpush3.bf16.msra.mxu0 %v5565_v14  ;;  %1623 = vmatprep.mubr.bf16.mxu1 %v76_v36  ;;  %v5589_v46 = vld [vmem:[#allocation2 + $0x108] sm:$0xff]   ;;  %v5593_v50 = vld [vmem:[#allocation2 + $0x110] sm:$0xff]   ;;  %v5595_v52 = vld [vmem:[#allocation2 + $0x158] sm:$0xff]  }
  0x35   :  { %4987 = vmatpush3.bf16.msra.mxu1 %v5566_v15  ;;  %4966 = vmatprep.subr.bf16.mxu0 %v5567_v16  ;;  %v5590_v47 = vld [vmem:[#allocation2 + $0x188] sm:$0xff]   ;;  %v5594_v51 = vld [vmem:[#allocation2 + $0x190] sm:$0xff]   ;;  %v5596_v53 = vld [vmem:[#allocation2 + $0x1d8] sm:$0xff]  }
  0x36   :  { %4988 = vmatprep.subr.bf16.mxu1 %v5568_v17  ;;  %v5597_v54 = vld [vmem:[#allocation2 + $0x118] sm:$0xff]   ;;  %v5599_v56 = vld [vmem:[#allocation2 + $0x160] sm:$0xff]   ;;  %v5603_v60 = vld [vmem:[#allocation2 + $0x168] sm:$0xff]  }
  0x37   :  { %v5598_v55 = vld [vmem:[#allocation2 + $0x198] sm:$0xff]   ;;  %v5600_v57 = vld [vmem:[#allocation2 + $0x1e0] sm:$0xff]   ;;  %v5604_v61 = vld [vmem:[#allocation2 + $0x1e8] sm:$0xff]  }
  0x38   :  { %4967 = vmatpush3.bf16.msra.mxu0 %v5569_v18  ;;  %v5601_v58 = vld [vmem:[#allocation2 + $0x120] sm:$0xff]   ;;  %v5605_v62 = vld [vmem:[#allocation2 + $0x128] sm:$0xff]   ;;  %v5607_v0 = vld [vmem:[#allocation2 + $0x170] sm:$0xff]  }
  0x39   :  { %4989 = vmatpush3.bf16.msra.mxu1 %v5570_v19  ;;  %4968 = vmatprep.subr.bf16.mxu0 %v5571_v20  ;;  %v5602_v59 = vld [vmem:[#allocation2 + $0x1a0] sm:$0xff]   ;;  %v5606_v63 = vld [vmem:[#allocation2 + $0x1a8] sm:$0xff]   ;;  %v5608_v1 = vld [vmem:[#allocation2 + $0x1f0] sm:$0xff]  }
  0x3a   :  { %4990 = vmatprep.subr.bf16.mxu1 %v5572_v21  ;;  %v5609_v2 = vld [vmem:[#allocation2 + $0x130] sm:$0xff]   ;;  %v5611_v4 = vld [vmem:[#allocation2 + $0x178] sm:$0xff]   ;;  %v56_v8 = vld [vmem:[%s6470_s0 + $0x28] sm:$0xff] }
  0x3b   :  { %v5610_v3 = vld [vmem:[#allocation2 + $0x1b0] sm:$0xff]   ;;  %v5612_v5 = vld [vmem:[#allocation2 + $0x1f8] sm:$0xff]   ;;  %v78_v10 = vpack.c.bf16 %v56_v8, %v56_v8  ;;  %v55_v12 = vld [vmem:[%s6470_s0 + $0x20] sm:$0xff] }
  0x3c   :  { %4969 = vmatpush3.bf16.msra.mxu0 %v5573_v22  ;;  %v5613_v6 = vld [vmem:[#allocation2 + $0x138] sm:$0xff]   ;;  %v57_v13 = vld [vmem:[%s6470_s0 + $0x30] sm:$0xff]  ;;  %v77_v14 = vpack.c.bf16 %v55_v12, %v55_v12  ;;  %v5615_v16 = vld [vmem:[#allocation2 + $0x240] sm:$0xff]  }
  0x3d   :  { %4991 = vmatpush3.bf16.msra.mxu1 %v5574_v23  ;;  %4970 = vmatprep.subr.bf16.mxu0 %v5575_v24  ;;  %v5614_v7 = vld [vmem:[#allocation2 + $0x1b8] sm:$0xff]   ;;  %v79_v15 = vpack.c.bf16 %v57_v13, %v57_v13  ;;  %v5616_v17 = vld [vmem:[#allocation2 + $0x2c0] sm:$0xff]   ;;  %v5619_v20 = vld [vmem:[#allocation2 + $0x248] sm:$0xff]  }
  0x3e   :  { %4992 = vmatprep.subr.bf16.mxu1 %v5576_v25  ;;  %v58_v9 = vld [vmem:[%s6470_s0 + $0x38] sm:$0xff]  ;;  %v5617_v18 = vld [vmem:[#allocation2 + $0x200] sm:$0xff]   ;;  %v5620_v21 = vld [vmem:[#allocation2 + $0x2c8] sm:$0xff]  }
  0x3f   :  { %v80_v11 = vpack.c.bf16 %v58_v9, %v58_v9  ;;  %v5618_v19 = vld [vmem:[#allocation2 + $0x280] sm:$0xff]   ;;  %v5621_v22 = vld [vmem:[#allocation2 + $0x208] sm:$0xff]   ;;  %v5623_v24 = vld [vmem:[#allocation2 + $0x250] sm:$0xff]  }
  0x40   :  { %4971 = vmatpush3.bf16.msra.mxu0 %v5577_v26  ;;  %v5622_v23 = vld [vmem:[#allocation2 + $0x288] sm:$0xff]   ;;  %v5624_v25 = vld [vmem:[#allocation2 + $0x2d0] sm:$0xff]   ;;  %v5631_v32 = vld [vmem:[#allocation2 + $0x260] sm:$0xff]  }
  0x41   :  { %4993 = vmatpush3.bf16.msra.mxu1 %v5578_v27  ;;  %4972 = vmatprep.subr.bf16.mxu0 %v5579_v28  ;;  %v5625_v26 = vld [vmem:[#allocation2 + $0x210] sm:$0xff]   ;;  %v5627_v28 = vld [vmem:[#allocation2 + $0x258] sm:$0xff]   ;;  %v5632_v33 = vld [vmem:[#allocation2 + $0x2e0] sm:$0xff]  }
  0x42   :  { %4994 = vmatprep.subr.bf16.mxu1 %v5580_v29  ;;  %v5626_v27 = vld [vmem:[#allocation2 + $0x290] sm:$0xff]   ;;  %v5628_v29 = vld [vmem:[#allocation2 + $0x2d8] sm:$0xff]   ;;  %v5633_v34 = vld [vmem:[#allocation2 + $0x220] sm:$0xff]  }
  0x43   :  { %v5634_v35 = vld [vmem:[#allocation2 + $0x2a0] sm:$0xff]   ;;  %v5635_v36 = vld [vmem:[#allocation2 + $0x268] sm:$0xff]  }
  0x44   :  { %4973 = vmatpush3.bf16.msra.mxu0 %v5581_v30  ;;  %v5629_v30 = vld [vmem:[#allocation2 + $0x218] sm:$0xff]   ;;  %v5636_v37 = vld [vmem:[#allocation2 + $0x2e8] sm:$0xff]   ;;  %v5663_v8 = vld [vmem:[#allocation2 + $0x360] sm:$0xff]  }
  0x45   :  { %4995 = vmatpush3.bf16.msra.mxu1 %v5582_v31  ;;  %5002 = vmatprep.subr.bf16.mxu0 %v5583_v40  ;;  %v5630_v31 = vld [vmem:[#allocation2 + $0x298] sm:$0xff]   ;;  %v5639_v40 = vld [vmem:[#allocation2 + $0x270] sm:$0xff]   ;;  %v5664_v9 = vld [vmem:[#allocation2 + $0x3e0] sm:$0xff]  }
  0x46   :  { %5024 = vmatprep.subr.bf16.mxu1 %v5584_v41  ;;  %v5640_v41 = vld [vmem:[#allocation2 + $0x2f0] sm:$0xff]   ;;  %v5667_v12 = vld [vmem:[#allocation2 + $0x368] sm:$0xff]  }
  0x47   :  { %1584 = vmatmul.mubr.bf16.vlgmr.msra.gmra.mrb[0].mxu0 %v73_v38  ;;  %v5637_v38 = vld [vmem:[#allocation2 + $0x228] sm:$0xff]  }
  0x48   :  { %1624 = vmatmul.mubr.bf16.vlgmr.msra.gmra.mrb[0].mxu1 %v75_v39  ;;  %5003 = vmatpush3.bf16.msra.mxu0 %v5585_v42  ;;  %v5638_v39 = vld [vmem:[#allocation2 + $0x2a8] sm:$0xff]   ;;  %v5641_v42 = vld [vmem:[#allocation2 + $0x230] sm:$0xff]  }
  0x49   :  { %5025 = vmatpush3.bf16.msra.mxu1 %v5586_v43  ;;  %5004 = vmatprep.subr.bf16.mxu0 %v5587_v44  ;;  %v5642_v43 = vld [vmem:[#allocation2 + $0x2b0] sm:$0xff]   ;;  %v5643_v44 = vld [vmem:[#allocation2 + $0x278] sm:$0xff]   ;;  %v5668_v13 = vld [vmem:[#allocation2 + $0x3e8] sm:$0xff]  }
  0x4a   :  { %5026 = vmatprep.subr.bf16.mxu1 %v5588_v45  ;;  %1663 = vmatprep.mubr.bf16.mxu0 %v78_v10  ;;  %v5644_v45 = vld [vmem:[#allocation2 + $0x2f8] sm:$0xff]   ;;  %v5665_v10 = vld [vmem:[#allocation2 + $0x320] sm:$0xff]  }
  0x4b   :  { %1703 = vmatprep.mubr.bf16.mxu1 %v80_v11  ;;  %v5666_v11 = vld [vmem:[#allocation2 + $0x3a0] sm:$0xff]  }
  0x4c   :  { %5005 = vmatpush3.bf16.msra.mxu0 %v5589_v46  ;;  %v5645_v46 = vld [vmem:[#allocation2 + $0x238] sm:$0xff]  }
  0x4d   :  { %5027 = vmatpush3.bf16.msra.mxu1 %v5590_v47  ;;  %5006 = vmatprep.subr.bf16.mxu0 %v5591_v48  ;;  %v5646_v47 = vld [vmem:[#allocation2 + $0x2b8] sm:$0xff]   ;;  %v60_v48 = vld [vmem:[%s6470_s0 + $0x48] sm:$0xff] }
  0x4e   :  { %5028 = vmatprep.subr.bf16.mxu1 %v5592_v49  ;;  %v82_v49 = vpack.c.bf16 %v60_v48, %v60_v48  ;;  %v5695_v48 = vld [vmem:[#allocation2 + $0x460] sm:$0xff]  }
  0x50   :  { %5007 = vmatpush3.bf16.msra.mxu0 %v5593_v50  ;;  %v62_v50 = vld [vmem:[%s6470_s0 + $0x58] sm:$0xff] }
  0x51   :  { %5029 = vmatpush3.bf16.msra.mxu1 %v5594_v51  ;;  %5008 = vmatprep.subr.bf16.mxu0 %v5595_v52  ;;  %v59_v51 = vld [vmem:[%s6470_s0 + $0x40] sm:$0xff]  ;;  %v61_v52 = vld [vmem:[%s6470_s0 + $0x50] sm:$0xff] }
  0x52   :  { %5030 = vmatprep.subr.bf16.mxu1 %v5596_v53  ;;  %v84_v53 = vpack.c.bf16 %v62_v50, %v62_v50  ;;  %v5697_v50 = vld [vmem:[#allocation2 + $0x420] sm:$0xff]  }
  0x54   :  { %5009 = vmatpush3.bf16.msra.mxu0 %v5597_v54  ;;  %v81_v54 = vpack.c.bf16 %v59_v51, %v59_v51  ;;  %v5698_v51 = vld [vmem:[#allocation2 + $0x4a0] sm:$0xff]  }
  0x55   :  { %5031 = vmatpush3.bf16.msra.mxu1 %v5598_v55  ;;  %5010 = vmatprep.subr.bf16.mxu0 %v5599_v56  ;;  %v83_v55 = vpack.c.bf16 %v61_v52, %v61_v52  ;;  %v5647_v56 = vld [vmem:[#allocation2 + $0x340] sm:$0xff]   ;;  %v5699_v52 = vld [vmem:[#allocation2 + $0x468] sm:$0xff]  }
  0x56   :  { %5032 = vmatprep.subr.bf16.mxu1 %v5600_v57  ;;  %v5648_v57 = vld [vmem:[#allocation2 + $0x3c0] sm:$0xff]  }
  0x58   :  { %5011 = vmatpush3.bf16.msra.mxu0 %v5601_v58  ;;  %v5649_v58 = vld [vmem:[#allocation2 + $0x300] sm:$0xff]  }
  0x59   :  { %5033 = vmatpush3.bf16.msra.mxu1 %v5602_v59  ;;  %5012 = vmatprep.subr.bf16.mxu0 %v5603_v60  ;;  %v5650_v59 = vld [vmem:[#allocation2 + $0x380] sm:$0xff]   ;;  %v5651_v60 = vld [vmem:[#allocation2 + $0x348] sm:$0xff]  }
  0x5a   :  { %5034 = vmatprep.subr.bf16.mxu1 %v5604_v61  ;;  %v5652_v61 = vld [vmem:[#allocation2 + $0x3c8] sm:$0xff]  }
  0x5c   :  { %5013 = vmatpush3.bf16.msra.mxu0 %v5605_v62  ;;  %v5653_v62 = vld [vmem:[#allocation2 + $0x308] sm:$0xff]  }
  0x5d   :  { %5035 = vmatpush3.bf16.msra.mxu1 %v5606_v63  ;;  %5014 = vmatprep.subr.bf16.mxu0 %v5607_v0  ;;  %v5654_v63 = vld [vmem:[#allocation2 + $0x388] sm:$0xff]   ;;  %v5655_v0 = vld [vmem:[#allocation2 + $0x350] sm:$0xff]  }
  0x5e   :  { %5036 = vmatprep.subr.bf16.mxu1 %v5608_v1  ;;  %v5656_v1 = vld [vmem:[#allocation2 + $0x3d0] sm:$0xff]  }
  0x60   :  { %5015 = vmatpush3.bf16.msra.mxu0 %v5609_v2  ;;  %v5657_v2 = vld [vmem:[#allocation2 + $0x310] sm:$0xff]  }
  0x61   :  { %5037 = vmatpush3.bf16.msra.mxu1 %v5610_v3  ;;  %5016 = vmatprep.subr.bf16.mxu0 %v5611_v4  ;;  %v5658_v3 = vld [vmem:[#allocation2 + $0x390] sm:$0xff]   ;;  %v5659_v4 = vld [vmem:[#allocation2 + $0x358] sm:$0xff]  }
  0x62   :  { %5038 = vmatprep.subr.bf16.mxu1 %v5612_v5  ;;  %v5660_v5 = vld [vmem:[#allocation2 + $0x3d8] sm:$0xff]  }
  0x64   :  { %5017 = vmatpush3.bf16.msra.mxu0 %v5613_v6  ;;  %v5661_v6 = vld [vmem:[#allocation2 + $0x318] sm:$0xff]  }
  0x65   :  { %5039 = vmatpush3.bf16.msra.mxu1 %v5614_v7  ;;  %5046 = vmatprep.subr.bf16.mxu0 %v5615_v16  ;;  %v5662_v7 = vld [vmem:[#allocation2 + $0x398] sm:$0xff]   ;;  %v5671_v16 = vld [vmem:[#allocation2 + $0x370] sm:$0xff]  }
  0x66   :  { %5068 = vmatprep.subr.bf16.mxu1 %v5616_v17  ;;  %v5672_v17 = vld [vmem:[#allocation2 + $0x3f0] sm:$0xff]  }
  0x67   :  { %1664 = vmatmul.mubr.bf16.vlgmr.msra.gmra.mrb[4].mxu0 %v77_v14  ;;  %v5669_v14 = vld [vmem:[#allocation2 + $0x328] sm:$0xff]  }
  0x68   :  { %1704 = vmatmul.mubr.bf16.vlgmr.msra.gmra.mrb[4].mxu1 %v79_v15  ;;  %5047 = vmatpush3.bf16.msra.mxu0 %v5617_v18  ;;  %v5670_v15 = vld [vmem:[#allocation2 + $0x3a8] sm:$0xff]   ;;  %v5673_v18 = vld [vmem:[#allocation2 + $0x330] sm:$0xff]  }
  0x69   :  { %5069 = vmatpush3.bf16.msra.mxu1 %v5618_v19  ;;  %5048 = vmatprep.subr.bf16.mxu0 %v5619_v20  ;;  %v5674_v19 = vld [vmem:[#allocation2 + $0x3b0] sm:$0xff]   ;;  %v5675_v20 = vld [vmem:[#allocation2 + $0x378] sm:$0xff]  }
  0x6a   :  { %5070 = vmatprep.subr.bf16.mxu1 %v5620_v21  ;;  %1743 = vmatprep.mubr.bf16.mxu0 %v82_v49  ;;  %v5676_v21 = vld [vmem:[#allocation2 + $0x3f8] sm:$0xff]   ;;  %v5696_v49 = vld [vmem:[#allocation2 + $0x4e0] sm:$0xff]  }
  0x6b   :  { %1783 = vmatprep.mubr.bf16.mxu1 %v84_v53  ;;  %v5700_v53 = vld [vmem:[#allocation2 + $0x4e8] sm:$0xff]  }
  0x6c   :  { %5049 = vmatpush3.bf16.msra.mxu0 %v5621_v22  ;;  %v5677_v22 = vld [vmem:[#allocation2 + $0x338] sm:$0xff]  }
  0x6d   :  { %5071 = vmatpush3.bf16.msra.mxu1 %v5622_v23  ;;  %5050 = vmatprep.subr.bf16.mxu0 %v5623_v24  ;;  %v5678_v23 = vld [vmem:[#allocation2 + $0x3b8] sm:$0xff]   ;;  %v64_v24 = vld [vmem:[%s6470_s0 + $0x68] sm:$0xff] }
  0x6e   :  { %5072 = vmatprep.subr.bf16.mxu1 %v5624_v25  ;;  %v66_v25 = vld [vmem:[%s6470_s0 + $0x78] sm:$0xff] }
  0x70   :  { %5051 = vmatpush3.bf16.msra.mxu0 %v5625_v26  ;;  %v63_v26 = vld [vmem:[%s6470_s0 + $0x60] sm:$0xff] }
  0x71   :  { %5073 = vmatpush3.bf16.msra.mxu1 %v5626_v27  ;;  %5052 = vmatprep.subr.bf16.mxu0 %v5627_v28  ;;  %v86_v27 = vpack.c.bf16 %v64_v24, %v64_v24  ;;  %v88_v28 = vpack.c.bf16 %v66_v25, %v66_v25  ;;  %v5724_v24 = vld [vmem:[#allocation4 + $0x58] sm:$0xff]  }
  0x72   :  { %5074 = vmatprep.subr.bf16.mxu1 %v5628_v29  ;;  %v85_v29 = vpack.c.bf16 %v63_v26, %v63_v26  ;;  %v5725_v25 = vld [vmem:[#allocation2 + $0x518] sm:$0xff]  }
  0x73   :  { %v5726_v26 = vld [vmem:[#allocation4 + $0x18] sm:$0xff]  }
  0x74   :  { %5053 = vmatpush3.bf16.msra.mxu0 %v5629_v30  ;;  %v65_v30 = vld [vmem:[%s6470_s0 + $0x70] sm:$0xff] }
  0x75   :  { %5075 = vmatpush3.bf16.msra.mxu1 %v5630_v31  ;;  %5054 = vmatprep.subr.bf16.mxu0 %v5631_v32  ;;  %v87_v31 = vpack.c.bf16 %v65_v30, %v65_v30  ;;  %v5679_v32 = vld [vmem:[#allocation2 + $0x440] sm:$0xff]  }
  0x76   :  { %5076 = vmatprep.subr.bf16.mxu1 %v5632_v33  ;;  %v5680_v33 = vld [vmem:[#allocation2 + $0x4c0] sm:$0xff]  }
  0x77   :  { %v5730_v30 = vld [vmem:[#allocation4 + $0x20] sm:$0xff]  }
  0x78   :  { %5055 = vmatpush3.bf16.msra.mxu0 %v5633_v34  ;;  %v5681_v34 = vld [vmem:[#allocation2 + $0x400] sm:$0xff]  }
  0x79   :  { %5077 = vmatpush3.bf16.msra.mxu1 %v5634_v35  ;;  %5056 = vmatprep.subr.bf16.mxu0 %v5635_v36  ;;  %v5682_v35 = vld [vmem:[#allocation2 + $0x480] sm:$0xff]   ;;  %v5683_v36 = vld [vmem:[#allocation2 + $0x448] sm:$0xff]  }
  0x7a   :  { %5078 = vmatprep.subr.bf16.mxu1 %v5636_v37  ;;  %v5684_v37 = vld [vmem:[#allocation2 + $0x4c8] sm:$0xff]  }
  0x7c   :  { %5057 = vmatpush3.bf16.msra.mxu0 %v5637_v38  ;;  %v5685_v38 = vld [vmem:[#allocation2 + $0x408] sm:$0xff]  }
  0x7d   :  { %5079 = vmatpush3.bf16.msra.mxu1 %v5638_v39  ;;  %5058 = vmatprep.subr.bf16.mxu0 %v5639_v40  ;;  %v5686_v39 = vld [vmem:[#allocation2 + $0x488] sm:$0xff]   ;;  %v5687_v40 = vld [vmem:[#allocation2 + $0x450] sm:$0xff]  }
  0x7e   :  { %5080 = vmatprep.subr.bf16.mxu1 %v5640_v41  ;;  %v5688_v41 = vld [vmem:[#allocation2 + $0x4d0] sm:$0xff]  }
  0x80   :  { %5059 = vmatpush3.bf16.msra.mxu0 %v5641_v42  ;;  %v5689_v42 = vld [vmem:[#allocation2 + $0x410] sm:$0xff]  }
  0x81   :  { %5081 = vmatpush3.bf16.msra.mxu1 %v5642_v43  ;;  %5060 = vmatprep.subr.bf16.mxu0 %v5643_v44  ;;  %v5690_v43 = vld [vmem:[#allocation2 + $0x490] sm:$0xff]   ;;  %v5691_v44 = vld [vmem:[#allocation2 + $0x458] sm:$0xff]  }
  0x82   :  { %5082 = vmatprep.subr.bf16.mxu1 %v5644_v45  ;;  %v5692_v45 = vld [vmem:[#allocation2 + $0x4d8] sm:$0xff]  }
  0x84   :  { %5061 = vmatpush3.bf16.msra.mxu0 %v5645_v46  ;;  %v5693_v46 = vld [vmem:[#allocation2 + $0x418] sm:$0xff]  }
  0x85   :  { %5083 = vmatpush3.bf16.msra.mxu1 %v5646_v47  ;;  %5090 = vmatprep.subr.bf16.mxu0 %v5647_v56  ;;  %v5694_v47 = vld [vmem:[#allocation2 + $0x498] sm:$0xff]   ;;  %v5703_v56 = vld [vmem:[#allocation2 + $0x470] sm:$0xff]  }
  0x86   :  { %5112 = vmatprep.subr.bf16.mxu1 %v5648_v57  ;;  %v5704_v57 = vld [vmem:[#allocation2 + $0x4f0] sm:$0xff]  }
  0x87   :  { %1744 = vmatmul.mubr.bf16.vlgmr.msra.gmra.mrb[8].mxu0 %v81_v54  ;;  %v5701_v54 = vld [vmem:[#allocation2 + $0x428] sm:$0xff]  }
  0x88   :  { %1784 = vmatmul.mubr.bf16.vlgmr.msra.gmra.mrb[8].mxu1 %v83_v55  ;;  %5091 = vmatpush3.bf16.msra.mxu0 %v5649_v58  ;;  %v5702_v55 = vld [vmem:[#allocation2 + $0x4a8] sm:$0xff]   ;;  %v5705_v58 = vld [vmem:[#allocation2 + $0x430] sm:$0xff]  }
  0x89   :  { %5113 = vmatpush3.bf16.msra.mxu1 %v5650_v59  ;;  %5092 = vmatprep.subr.bf16.mxu0 %v5651_v60  ;;  %v5706_v59 = vld [vmem:[#allocation2 + $0x4b0] sm:$0xff]   ;;  %v5707_v60 = vld [vmem:[#allocation2 + $0x478] sm:$0xff]  }
  0x8a   :  { %5114 = vmatprep.subr.bf16.mxu1 %v5652_v61  ;;  %1823 = vmatprep.mubr.bf16.mxu0 %v86_v27  ;;  %v5987_v61 = vld [vmem:[%s6470_s0 + $0x8] sm:$0xff]  ;;  %v5727_v27 = vld [vmem:[#allocation2 + $0x560] sm:$0xff]  }
  0x8b   :  { %1863 = vmatprep.mubr.bf16.mxu1 %v88_v28  ;;  %v5728_v28 = vld [vmem:[#allocation4 + $0x60] sm:$0xff]  }
  0x8c   :  { %5093 = vmatpush3.bf16.msra.mxu0 %v5653_v62  ;;  %v96_v62 = vmul.f32 %v5987_v61, %v5987_v61  ;;  %v5748_v61 = vld [vmem:[#allocation4 + $0x148] sm:$0xff]  }
  0x8d   :  { %5115 = vmatpush3.bf16.msra.mxu1 %v5654_v63  ;;  %5094 = vmatprep.subr.bf16.mxu0 %v5655_v0  ;;  %v5708_v63 = vld [vmem:[#allocation2 + $0x4f8] sm:$0xff]  }
  0x8e   :  { %5116 = vmatprep.subr.bf16.mxu1 %v5656_v1  ;;  %v5709_v0 = vld [vmem:[#allocation2 + $0x438] sm:$0xff]  }
  0x8f   :  { %v5710_v1 = vld [vmem:[#allocation2 + $0x4b8] sm:$0xff]  }
  0x90   :  { %5095 = vmatpush3.bf16.msra.mxu0 %v5657_v2  ;;  %v68_v2 = vld [vmem:[%s6470_s0 + $0x88] sm:$0xff] }
  0x91   :  { %5117 = vmatpush3.bf16.msra.mxu1 %v5658_v3  ;;  %5096 = vmatprep.subr.bf16.mxu0 %v5659_v4  ;;  %v70_v3 = vld [vmem:[%s6470_s0 + $0x98] sm:$0xff]  ;;  %v90_v4 = vpack.c.bf16 %v68_v2, %v68_v2  ;;  %v5753_v2 = vld [vmem:[#allocation4 + $0x90] sm:$0xff]  }
  0x92   :  { %5118 = vmatprep.subr.bf16.mxu1 %v5660_v5  ;;  %v92_v5 = vpack.c.bf16 %v70_v3, %v70_v3  ;;  %v5754_v3 = vld [vmem:[#allocation4 + $0x110] sm:$0xff]  }
  0x94   :  { %5097 = vmatpush3.bf16.msra.mxu0 %v5661_v6  ;;  %v67_v6 = vld [vmem:[%s6470_s0 + $0x80] sm:$0xff] }
  0x95   :  { %5119 = vmatpush3.bf16.msra.mxu1 %v5662_v7  ;;  %5098 = vmatprep.subr.bf16.mxu0 %v5663_v8  ;;  %v69_v7 = vld [vmem:[%s6470_s0 + $0x90] sm:$0xff]  ;;  %v118_v8 = vpack.c.bf16 %v96_v62, %v96_v62  ;;  %v5749_v62 = vld [vmem:[#allocation4 + $0x88] sm:$0xff]  }
  0x96   :  { %5120 = vmatprep.subr.bf16.mxu1 %v5664_v9  ;;  %v89_v9 = vpack.c.bf16 %v67_v6, %v67_v6  ;;  %v5757_v6 = vld [vmem:[#allocation4 + $0x98] sm:$0xff]  }
  0x98   :  { %5099 = vmatpush3.bf16.msra.mxu0 %v5665_v10  ;;  %v91_v10 = vpack.c.bf16 %v69_v7, %v69_v7  ;;  %v5758_v7 = vld [vmem:[#allocation4 + $0x118] sm:$0xff]  }
  0x99   :  { %5121 = vmatpush3.bf16.msra.mxu1 %v5666_v11  ;;  %5100 = vmatprep.subr.bf16.mxu0 %v5667_v12  ;;  %v5711_v11 = vld [vmem:[#allocation2 + $0x540] sm:$0xff]  }
  0x9a   :  { %5122 = vmatprep.subr.bf16.mxu1 %v5668_v13  ;;  %v5712_v12 = vld [vmem:[#allocation4 + $0x40] sm:$0xff]  }
  0x9b   :  { %v5713_v13 = vld [vmem:[#allocation2 + $0x500] sm:$0xff]  }
  0x9c   :  { %5101 = vmatpush3.bf16.msra.mxu0 %v5669_v14  ;;  %v5714_v14 = vld [vmem:[#allocation4] sm:$0xff]  }
  0x9d   :  { %5123 = vmatpush3.bf16.msra.mxu1 %v5670_v15  ;;  %5102 = vmatprep.subr.bf16.mxu0 %v5671_v16  ;;  %v5715_v15 = vld [vmem:[#allocation2 + $0x548] sm:$0xff]  }
  0x9e   :  { %5124 = vmatprep.subr.bf16.mxu1 %v5672_v17  ;;  %v5716_v16 = vld [vmem:[#allocation4 + $0x48] sm:$0xff]  }
  0x9f   :  { %v5717_v17 = vld [vmem:[#allocation2 + $0x508] sm:$0xff]  }
  0xa0   :  { %5103 = vmatpush3.bf16.msra.mxu0 %v5673_v18  ;;  %v5718_v18 = vld [vmem:[#allocation4 + $0x8] sm:$0xff]  }
  0xa1   :  { %5125 = vmatpush3.bf16.msra.mxu1 %v5674_v19  ;;  %5104 = vmatprep.subr.bf16.mxu0 %v5675_v20  ;;  %v5719_v19 = vld [vmem:[#allocation2 + $0x550] sm:$0xff]  }
  0xa2   :  { %5126 = vmatprep.subr.bf16.mxu1 %v5676_v21  ;;  %v5720_v20 = vld [vmem:[#allocation4 + $0x50] sm:$0xff]  }
  0xa3   :  { %v5721_v21 = vld [vmem:[#allocation2 + $0x510] sm:$0xff]  }
  0xa4   :  { %5105 = vmatpush3.bf16.msra.mxu0 %v5677_v22  ;;  %v5722_v22 = vld [vmem:[#allocation4 + $0x10] sm:$0xff]  }
  0xa5   :  { %5127 = vmatpush3.bf16.msra.mxu1 %v5678_v23  ;;  %5134 = vmatprep.subr.bf16.mxu0 %v5679_v32  ;;  %v5723_v23 = vld [vmem:[#allocation2 + $0x558] sm:$0xff]   ;;  %v5732_v32 = vld [vmem:[#allocation4 + $0x68] sm:$0xff]  }
  0xa6   :  { %5156 = vmatprep.subr.bf16.mxu1 %v5680_v33  ;;  %v5733_v33 = vld [vmem:[#allocation2 + $0x528] sm:$0xff]  }
  0xa7   :  { %1824 = vmatmul.mubr.bf16.vlgmr.msra.gmra.mrb[12].mxu0 %v85_v29  ;;  %v5729_v29 = vld [vmem:[#allocation2 + $0x520] sm:$0xff]  }
  0xa8   :  { %1864 = vmatmul.mubr.bf16.vlgmr.msra.gmra.mrb[12].mxu1 %v87_v31  ;;  %5135 = vmatpush3.bf16.msra.mxu0 %v5681_v34  ;;  %v5731_v31 = vld [vmem:[#allocation2 + $0x568] sm:$0xff]  }
  0xa9   :  { %5157 = vmatpush3.bf16.msra.mxu1 %v5682_v35  ;;  %5136 = vmatprep.subr.bf16.mxu0 %v5683_v36  ;;  %v5734_v34 = vld [vmem:[#allocation4 + $0x28] sm:$0xff]   ;;  %v5735_v35 = vld [vmem:[#allocation2 + $0x570] sm:$0xff]  }
  0xaa   :  { %5158 = vmatprep.subr.bf16.mxu1 %v5684_v37  ;;  %1903 = vmatprep.mubr.bf16.mxu0 %v90_v4  ;;  %v5736_v36 = vld [vmem:[#allocation4 + $0x70] sm:$0xff]   ;;  %v5755_v4 = vld [vmem:[#allocation4 + $0xd8] sm:$0xff]  }
  0xab   :  { %1943 = vmatprep.mubr.bf16.mxu1 %v92_v5  ;;  %v5737_v37 = vld [vmem:[#allocation2 + $0x530] sm:$0xff]   ;;  %v5756_v5 = vld [vmem:[#allocation4 + $0x158] sm:$0xff]  }
  0xac   :  { %5137 = vmatpush3.bf16.msra.mxu0 %v5685_v38  ;;  %v5738_v38 = vld [vmem:[#allocation4 + $0x30] sm:$0xff]  }
  0xad   :  { %5159 = vmatpush3.bf16.msra.mxu1 %v5686_v39  ;;  %5138 = vmatprep.subr.bf16.mxu0 %v5687_v40  ;;  %v5988_v39 = vld [vmem:[%s6470_s0] sm:$0xff] }
  0xae   :  { %5160 = vmatprep.subr.bf16.mxu1 %v5688_v41  ;;  %v95_v40 = vmul.f32 %v5988_v39, %v5988_v39  ;;  %v5739_v41 = vld [vmem:[#allocation2 + $0x578] sm:$0xff]   ;;  %v5778_v39 = vld [vmem:[#allocation4 + $0x200] sm:$0xff]  }
  0xb0   :  { %5139 = vmatpush3.bf16.msra.mxu0 %v5689_v42  ;;  %v5989_v42 = vld [vmem:[%s6470_s0 + $0x18] sm:$0xff] }
  0xb1   :  { %5161 = vmatpush3.bf16.msra.mxu1 %v5690_v43  ;;  %5140 = vmatprep.subr.bf16.mxu0 %v5691_v44  ;;  %v98_v43 = vmul.f32 %v5989_v42, %v5989_v42  ;;  %v5740_v44 = vld [vmem:[#allocation4 + $0x78] sm:$0xff]   ;;  %v5781_v42 = vld [vmem:[#allocation4 + $0x188] sm:$0xff]  }
  0xb2   :  { %5162 = vmatprep.subr.bf16.mxu1 %v5692_v45  ;;  %v5741_v45 = vld [vmem:[#allocation2 + $0x538] sm:$0xff]  }
  0xb4   :  { %5141 = vmatpush3.bf16.msra.mxu0 %v5693_v46  ;;  %v5990_v46 = vld [vmem:[%s6470_s0 + $0x28] sm:$0xff] }
  0xb5   :  { %5163 = vmatpush3.bf16.msra.mxu1 %v5694_v47  ;;  %5142 = vmatprep.subr.bf16.mxu0 %v5695_v48  ;;  %v100_v47 = vmul.f32 %v5990_v46, %v5990_v46  ;;  %v5742_v48 = vld [vmem:[#allocation4 + $0x38] sm:$0xff]   ;;  %v5784_v46 = vld [vmem:[#allocation4 + $0x250] sm:$0xff]  }
  0xb6   :  { %5164 = vmatprep.subr.bf16.mxu1 %v5696_v49  ;;  %v72_v49 = vld [vmem:[%s6470_s0 + $0xa8] sm:$0xff] }
  0xb8   :  { %5143 = vmatpush3.bf16.msra.mxu0 %v5697_v50  ;;  %v117_v50 = vpack.c.bf16 %v95_v40, %v95_v40  ;;  %v5779_v40 = vld [vmem:[#allocation4 + $0x1c8] sm:$0xff]  }
  0xb9   :  { %5165 = vmatpush3.bf16.msra.mxu1 %v5698_v51  ;;  %5144 = vmatprep.subr.bf16.mxu0 %v5699_v52  ;;  %v94_v51 = vpack.c.bf16 %v72_v49, %v72_v49  ;;  %v71_v52 = vld [vmem:[%s6470_s0 + $0xa0] sm:$0xff]  ;;  %v5786_v49 = vld [vmem:[#allocation4 + $0x210] sm:$0xff]  }
  0xba   :  { %5166 = vmatprep.subr.bf16.mxu1 %v5700_v53  ;;  %v120_v53 = vpack.c.bf16 %v98_v43, %v98_v43  ;;  %v491_v43 = vlaneseq }
  0xbc   :  { %5145 = vmatpush3.bf16.msra.mxu0 %v5701_v54  ;;  %v93_v54 = vpack.c.bf16 %v71_v52, %v71_v52  ;;  %v5789_v52 = vld [vmem:[#allocation4 + $0x198] sm:$0xff]  }
  0xbd   :  { %5167 = vmatpush3.bf16.msra.mxu1 %v5702_v55  ;;  %5146 = vmatprep.subr.bf16.mxu0 %v5703_v56  ;;  %v5743_v55 = vld [vmem:[#allocation4 + $0xc0] sm:$0xff]  }
  0xbe   :  { %5168 = vmatprep.subr.bf16.mxu1 %v5704_v57  ;;  %v5744_v56 = vld [vmem:[#allocation4 + $0x140] sm:$0xff]   ;;  %v122_v57 = vpack.c.bf16 %v100_v47, %v100_v47  ;;  %v5785_v47 = vld [vmem:[#allocation4 + $0x190] sm:$0xff]  }
  0xc0   :  { %5147 = vmatpush3.bf16.msra.mxu0 %v5705_v58  ;;  %v5745_v58 = vld [vmem:[#allocation4 + $0x80] sm:$0xff]  }
  0xc1   :  { %5169 = vmatpush3.bf16.msra.mxu1 %v5706_v59  ;;  %5148 = vmatprep.subr.bf16.mxu0 %v5707_v60  ;;  %v5746_v59 = vld [vmem:[#allocation4 + $0x100] sm:$0xff]   ;;  %v5747_v60 = vld [vmem:[#allocation4 + $0xc8] sm:$0xff]  }
  0xc2   :  { %5170 = vmatprep.subr.bf16.mxu1 %v5708_v63  ;;  %v5750_v63 = vld [vmem:[#allocation4 + $0x108] sm:$0xff]  }
  0xc4   :  { %5149 = vmatpush3.bf16.msra.mxu0 %v5709_v0  ;;  %v5751_v0 = vld [vmem:[#allocation4 + $0xd0] sm:$0xff]  }
  0xc5   :  { %5171 = vmatpush3.bf16.msra.mxu1 %v5710_v1  ;;  %5178 = vmatprep.subr.bf16.mxu0 %v5711_v11  ;;  %v5752_v1 = vld [vmem:[#allocation4 + $0x150] sm:$0xff]   ;;  %v5762_v11 = vld [vmem:[#allocation4 + $0x120] sm:$0xff]  }
  0xc6   :  { %5200 = vmatprep.subr.bf16.mxu1 %v5712_v12  ;;  %v5763_v12 = vld [vmem:[#allocation4 + $0xe8] sm:$0xff]  }
  0xc7   :  { %1904 = vmatmul.mubr.bf16.vlgmr.msra.gmra.mrb[16].mxu0 %v89_v9  ;;  %v5760_v9 = vld [vmem:[#allocation4 + $0x160] sm:$0xff]  }
  0xc8   :  { %1944 = vmatmul.mubr.bf16.vlgmr.msra.gmra.mrb[16].mxu1 %v91_v10  ;;  %5179 = vmatpush3.bf16.msra.mxu0 %v5713_v13  ;;  %v5761_v10 = vld [vmem:[#allocation4 + $0xa0] sm:$0xff]   ;;  %v5764_v13 = vld [vmem:[#allocation4 + $0x168] sm:$0xff]  }
  0xc9   :  { %3435 = vmatprep.mubr.bf16.mxu1 %v118_v8  ;;  %5201 = vmatpush3.bf16.msra.mxu1 %v5714_v14  ;;  %v5759_v8 = vld [vmem:[#allocation4 + $0xe0] sm:$0xff]   ;;  %v5765_v14 = vld [vmem:[#allocation4 + $0xa8] sm:$0xff]  }
  0xca   :  { %5180 = vmatprep.subr.bf16.mxu0 %v5715_v15  ;;  %5202 = vmatprep.subr.bf16.mxu1 %v5716_v16  ;;  %v5766_v15 = vld [vmem:[#allocation4 + $0x128] sm:$0xff]   ;;  %v5767_v16 = vld [vmem:[#allocation4 + $0xf0] sm:$0xff]  }
  0xcb   :  { %1983 = vmatprep.mubr.bf16.mxu0 %v94_v51  ;;  %v5788_v51 = vld [vmem:[#allocation4 + $0x258] sm:$0xff]  }
  0xcc   :  { %5181 = vmatpush3.bf16.msra.mxu0 %v5717_v17  ;;  %v5768_v17 = vld [vmem:[#allocation4 + $0x170] sm:$0xff]  }
  0xcd   :  { %5203 = vmatpush3.bf16.msra.mxu1 %v5718_v18  ;;  %5182 = vmatprep.subr.bf16.mxu0 %v5719_v19  ;;  %v5769_v18 = vld [vmem:[#allocation4 + $0xb0] sm:$0xff]  }
  0xce   :  { %5204 = vmatprep.subr.bf16.mxu1 %v5720_v20  ;;  %v5991_v19 = vld [vmem:[%s6470_s0 + $0x10] sm:$0xff] }
  0xcf   :  { %v97_v20 = vmul.f32 %v5991_v19, %v5991_v19  ;;  %v5803_v19 = vld [vmem:[#allocation4 + $0x1f8] sm:$0xff]  }
  0xd0   :  { %5183 = vmatpush3.bf16.msra.mxu0 %v5721_v21  ;;  %v5770_v21 = vld [vmem:[#allocation4 + $0x130] sm:$0xff]  }
  0xd1   :  { %5205 = vmatpush3.bf16.msra.mxu1 %v5722_v22  ;;  %5184 = vmatprep.subr.bf16.mxu0 %v5723_v23  ;;  %v5771_v22 = vld [vmem:[#allocation4 + $0xf8] sm:$0xff]   ;;  %v5992_v23 = vld [vmem:[%s6470_s0 + $0x20] sm:$0xff] }
  0xd2   :  { %5206 = vmatprep.subr.bf16.mxu1 %v5724_v24  ;;  %v99_v24 = vmul.f32 %v5992_v23, %v5992_v23  ;;  %v5997_v23 = vld [vmem:[%s6470_s0 + $0x58] sm:$0xff] }
  0xd4   :  { %5185 = vmatpush3.bf16.msra.mxu0 %v5725_v25  ;;  %v5772_v25 = vld [vmem:[#allocation4 + $0x178] sm:$0xff]  }
  0xd5   :  { %5207 = vmatpush3.bf16.msra.mxu1 %v5726_v26  ;;  %5186 = vmatprep.subr.bf16.mxu0 %v5727_v27  ;;  %v5993_v26 = vld [vmem:[%s6470_s0 + $0x38] sm:$0xff] }
  0xd6   :  { %5208 = vmatprep.subr.bf16.mxu1 %v5728_v28  ;;  %v102_v27 = vmul.f32 %v5993_v26, %v5993_v26  ;;  %v5773_v28 = vld [vmem:[#allocation4 + $0xb8] sm:$0xff]   ;;  %v5998_v26 = vld [vmem:[%s6470_s0 + $0x68] sm:$0xff] }
  0xd8   :  { %5187 = vmatpush3.bf16.msra.mxu0 %v5729_v29  ;;  %v5994_v29 = vld [vmem:[%s6470_s0 + $0x48] sm:$0xff] }
  0xd9   :  { %5209 = vmatpush3.bf16.msra.mxu1 %v5730_v30  ;;  %5188 = vmatprep.subr.bf16.mxu0 %v5731_v31  ;;  %v104_v30 = vmul.f32 %v5994_v29, %v5994_v29  ;;  %v119_v31 = vpack.c.bf16 %v97_v20, %v97_v20  ;;  %v5996_v20 = vld [vmem:[%s6470_s0 + $0x40] sm:$0xff] }
  0xda   :  { %5210 = vmatprep.subr.bf16.mxu1 %v5732_v32  ;;  %v5774_v32 = vld [vmem:[#allocation4 + $0x138] sm:$0xff]  }
  0xdc   :  { %5189 = vmatpush3.bf16.msra.mxu0 %v5733_v33  ;;  %v121_v33 = vpack.c.bf16 %v99_v24, %v99_v24  ;;  %v106_v24 = vmul.f32 %v5997_v23, %v5997_v23 }
  0xdd   :  { %5211 = vmatpush3.bf16.msra.mxu1 %v5734_v34  ;;  %5190 = vmatprep.subr.bf16.mxu0 %v5735_v35  ;;  %v5775_v34 = vld [vmem:[#allocation4 + $0x1c0] sm:$0xff]  }
  0xde   :  { %5212 = vmatprep.subr.bf16.mxu1 %v5736_v36  ;;  %v5776_v35 = vld [vmem:[#allocation4 + $0x240] sm:$0xff]   ;;  %v124_v36 = vpack.c.bf16 %v102_v27, %v102_v27  ;;  %v108_v27 = vmul.f32 %v5998_v26, %v5998_v26 }
  0xdf   :  { %v5840_v26 = vld [vmem:[#allocation4 + $0x440] sm:$0xff]  }
  0xe0   :  { %5191 = vmatpush3.bf16.msra.mxu0 %v5737_v37  ;;  %v5777_v37 = vld [vmem:[#allocation4 + $0x180] sm:$0xff]  }
  0xe1   :  { %5213 = vmatpush3.bf16.msra.mxu1 %v5738_v38  ;;  %5192 = vmatprep.subr.bf16.mxu0 %v5739_v41  ;;  %v126_v38 = vpack.c.bf16 %v104_v30, %v104_v30  ;;  %v5780_v41 = vld [vmem:[#allocation4 + $0x248] sm:$0xff]  }
  0xe2   :  { %5214 = vmatprep.subr.bf16.mxu1 %v5740_v44  ;;  %v5782_v44 = vld [vmem:[#allocation4 + $0x208] sm:$0xff]  }
  0xe4   :  { %5193 = vmatpush3.bf16.msra.mxu0 %v5741_v45  ;;  %v5783_v45 = vld [vmem:[#allocation4 + $0x1d0] sm:$0xff]  }
  0xe5   :  { %5215 = vmatpush3.bf16.msra.mxu1 %v5742_v48  ;;  %5222 = vmatprep.subr.bf16.mxu0 %v5743_v55  ;;  %v6209_v48 = vshrl.u32 %v491_v43, 7  ;;  %v5817_v43 = vld [vmem:[#allocation4 + $0x290] sm:$0xff]  }
  0xe6   :  { %5244 = vmatprep.subr.bf16.mxu1 %v5744_v56  ;;  %v5791_v56 = vld [vmem:[#allocation4 + $0x1e0] sm:$0xff]  }
  0xe7   :  { %1984 = vmatmul.mubr.bf16.vlgmr.msra.gmra.mrb[20].mxu0 %v93_v54  ;;  %v5790_v54 = vld [vmem:[#allocation4 + $0x218] sm:$0xff]  }
  0xe8   :  { %3436 = vmatmul.mubr.bf16.vlgmr.msra.gmra.mrb[20].mxu1 %v117_v50  ;;  %5223 = vmatpush3.bf16.msra.mxu0 %v5745_v58  ;;  %v5787_v50 = vld [vmem:[#allocation4 + $0x1d8] sm:$0xff]   ;;  %v5792_v58 = vld [vmem:[#allocation4 + $0x260] sm:$0xff]  }
  0xe9   :  { %3475 = vmatprep.mubr.bf16.mxu0 %v120_v53  ;;  %5245 = vmatpush3.bf16.msra.mxu1 %v5746_v59  ;;  %v493_v53 = vsub.s32 0, %v6209_v48 }
  0xea   :  { %3515 = vmatprep.mubr.bf16.mxu1 %v122_v57  ;;  %5224 = vmatprep.subr.bf16.mxu0 %v5747_v60  ;;  %v5793_v60 = vld [vmem:[#allocation4 + $0x1a0] sm:$0xff]  }
  0xeb   :  { %5246 = vmatprep.subr.bf16.mxu1 %v5748_v61 }
  0xec   :  { %5225 = vmatpush3.bf16.msra.mxu0 %v5749_v62 }
  0xed   :  { %5247 = vmatpush3.bf16.msra.mxu1 %v5750_v63  ;;  %5226 = vmatprep.subr.bf16.mxu0 %v5751_v0  ;;  %v5794_v63 = vld [vmem:[#allocation4 + $0x220] sm:$0xff]  }
  0xee   :  { %5248 = vmatprep.subr.bf16.mxu1 %v5752_v1  ;;  %v49_v0 = vld [vmem:[%s6474_s4] sm:$0xff] }
  0xf0   :  { %5227 = vmatpush3.bf16.msra.mxu0 %v5753_v2 }
  0xf1   :  { %5249 = vmatpush3.bf16.msra.mxu1 %v5754_v3  ;;  %5228 = vmatprep.subr.bf16.mxu0 %v5755_v4  ;;  %v494_v4 = vrot.slane %v49_v0, %v493_v53  ;;  %v5828_v0 = vld [vmem:[#allocation4 + $0x368] sm:$0xff]  }
  0xf2   :  { %5250 = vmatprep.subr.bf16.mxu1 %v5756_v5  ;;  %v5795_v5 = vld [vmem:[#allocation4 + $0x1e8] sm:$0xff]  }
  0xf4   :  { %5229 = vmatpush3.bf16.msra.mxu0 %v5757_v6 }
  0xf5   :  { %5251 = vmatpush3.bf16.msra.mxu1 %v5758_v7  ;;  %5230 = vmatprep.subr.bf16.mxu0 %v5759_v8  ;;  %v5796_v7 = vld [vmem:[#allocation4 + $0x268] sm:$0xff]  }
  0xf6   :  { %5252 = vmatprep.subr.bf16.mxu1 %v5760_v9 }
  0xf8   :  { %5231 = vmatpush3.bf16.msra.mxu0 %v5761_v10  ;;  %v5797_v10 = vld [vmem:[#allocation4 + $0x1a8] sm:$0xff]  }
  0xf9   :  { %5253 = vmatpush3.bf16.msra.mxu1 %v5762_v11  ;;  %5232 = vmatprep.subr.bf16.mxu0 %v5763_v12  ;;  %v5798_v11 = vld [vmem:[#allocation4 + $0x228] sm:$0xff]  }
  0xfa   :  { %5254 = vmatprep.subr.bf16.mxu1 %v5764_v13  ;;  %v5799_v13 = vld [vmem:[#allocation4 + $0x1f0] sm:$0xff]  }
  0xfc   :  { %5233 = vmatpush3.bf16.msra.mxu0 %v5765_v14  ;;  %v5800_v14 = vld [vmem:[#allocation4 + $0x270] sm:$0xff]  }
  0xfd   :  { %5255 = vmatpush3.bf16.msra.mxu1 %v5766_v15  ;;  %5234 = vmatprep.subr.bf16.mxu0 %v5767_v16  ;;  %v5801_v15 = vld [vmem:[#allocation4 + $0x1b0] sm:$0xff]  }
  0xfe   :  { %5256 = vmatprep.subr.bf16.mxu1 %v5768_v17  ;;  %v5802_v16 = vld [vmem:[#allocation4 + $0x230] sm:$0xff]  }
  0xff   :  { %v5995_v17 = vld [vmem:[%s6470_s0 + $0x30] sm:$0xff] }
 0x100   :  { %5235 = vmatpush3.bf16.msra.mxu0 %v5769_v18  ;;  %v101_v18 = vmul.f32 %v5995_v17, %v5995_v17  ;;  %v6001_v17 = vld [vmem:[%s6470_s0 + $0x78] sm:$0xff] }
 0x101   :  { %5257 = vmatpush3.bf16.msra.mxu1 %v5770_v21  ;;  %5236 = vmatprep.subr.bf16.mxu0 %v5771_v22  ;;  %v103_v21 = vmul.f32 %v5996_v20, %v5996_v20  ;;  %v5804_v22 = vld [vmem:[#allocation4 + $0x278] sm:$0xff]   ;;  %v6002_v20 = vld [vmem:[%s6470_s0 + $0x88] sm:$0xff] }
 0x102   :  { %5258 = vmatprep.subr.bf16.mxu1 %v5772_v25  ;;  %v5805_v25 = vld [vmem:[#allocation4 + $0x1b8] sm:$0xff]   ;;  %v123_v29 = vpack.c.bf16 %v101_v18, %v101_v18  ;;  %v110_v18 = vmul.f32 %v6001_v17, %v6001_v17 }
 0x103   :  { %v125_v30 = vpack.c.bf16 %v103_v21, %v103_v21  ;;  %v112_v21 = vmul.f32 %v6002_v20, %v6002_v20  ;;  %v5872_v20 = vld [vmem:[#allocation4 + $0x540] sm:$0xff]  }
 0x104   :  { %5237 = vmatpush3.bf16.msra.mxu0 %v5773_v28  ;;  %v5806_v28 = vld [vmem:[#allocation4 + $0x238] sm:$0xff]  }
 0x105   :  { %5259 = vmatpush3.bf16.msra.mxu1 %v5774_v32  ;;  %5266 = vmatprep.subr.bf16.mxu0 %v5775_v34  ;;  %v5808_v32 = vld [vmem:[#allocation4 + $0x340] sm:$0xff]  }
 0x106   :  { %5288 = vmatprep.subr.bf16.mxu1 %v5776_v35  ;;  %v5809_v34 = vld [vmem:[#allocation4 + $0x280] sm:$0xff]   ;;  %v130_v35 = vpack.c.bf16 %v108_v27, %v108_v27  ;;  %v132_v27 = vpack.c.bf16 %v110_v18, %v110_v18 }
 0x107   :  { %3476 = vmatmul.mubr.bf16.vlgmr.msra.gmra.mrb[24].mxu0 %v119_v31  ;;  %v5807_v31 = vld [vmem:[#allocation4 + $0x2c0] sm:$0xff]  }
 0x108   :  { %3516 = vmatmul.mubr.bf16.vlgmr.msra.gmra.mrb[24].mxu1 %v121_v33  ;;  %5267 = vmatpush3.bf16.msra.mxu0 %v5777_v37  ;;  %v128_v33 = vpack.c.bf16 %v106_v24, %v106_v24  ;;  %v5811_v37 = vld [vmem:[#allocation4 + $0x2c8] sm:$0xff]  }
 0x109   :  { %5289 = vmatpush3.bf16.msra.mxu1 %v5778_v39  ;;  %3555 = vmatprep.mubr.bf16.mxu0 %v124_v36  ;;  %v5810_v36 = vld [vmem:[#allocation4 + $0x300] sm:$0xff]   ;;  %v5813_v39 = vld [vmem:[#allocation4 + $0x288] sm:$0xff]  }
 0x10a   :  { %5268 = vmatprep.subr.bf16.mxu0 %v5779_v40  ;;  %3595 = vmatprep.mubr.bf16.mxu1 %v126_v38  ;;  %v5812_v38 = vld [vmem:[#allocation4 + $0x348] sm:$0xff]  }
 0x10b   :  { %5290 = vmatprep.subr.bf16.mxu1 %v5780_v41  ;;  %v5814_v40 = vld [vmem:[#allocation4 + $0x308] sm:$0xff]   ;;  %v5815_v41 = vld [vmem:[#allocation4 + $0x2d0] sm:$0xff]  }
 0x10c   :  { %5269 = vmatpush3.bf16.msra.mxu0 %v5781_v42  ;;  %v5816_v42 = vld [vmem:[#allocation4 + $0x350] sm:$0xff]  }
 0x10d   :  { %5291 = vmatpush3.bf16.msra.mxu1 %v5782_v44  ;;  %5270 = vmatprep.subr.bf16.mxu0 %v5783_v45  ;;  %v5818_v44 = vld [vmem:[#allocation4 + $0x310] sm:$0xff]   ;;  %v5819_v45 = vld [vmem:[#allocation4 + $0x2d8] sm:$0xff]  }
 0x10e   :  { %5292 = vmatprep.subr.bf16.mxu1 %v5784_v46  ;;  %v5820_v46 = vld [vmem:[#allocation4 + $0x358] sm:$0xff]  }
 0x110   :  { %5271 = vmatpush3.bf16.msra.mxu0 %v5785_v47  ;;  %v5821_v47 = vld [vmem:[#allocation4 + $0x298] sm:$0xff]  }
 0x111   :  { %5293 = vmatpush3.bf16.msra.mxu1 %v5786_v49  ;;  %5272 = vmatprep.subr.bf16.mxu0 %v5787_v50  ;;  %v5822_v49 = vld [vmem:[#allocation4 + $0x318] sm:$0xff]   ;;  %v5823_v50 = vld [vmem:[#allocation4 + $0x2e0] sm:$0xff]  }
 0x112   :  { %5294 = vmatprep.subr.bf16.mxu1 %v5788_v51 }
 0x114   :  { %5273 = vmatpush3.bf16.msra.mxu0 %v5789_v52  ;;  %v5824_v52 = vld [vmem:[#allocation4 + $0x360] sm:$0xff]  }
 0x115   :  { %5295 = vmatpush3.bf16.msra.mxu1 %v5790_v54  ;;  %5274 = vmatprep.subr.bf16.mxu0 %v5791_v56 }
 0x116   :  { %5296 = vmatprep.subr.bf16.mxu1 %v5792_v58 }
 0x118   :  { %5275 = vmatpush3.bf16.msra.mxu0 %v5793_v60 }
 0x119   :  { %5297 = vmatpush3.bf16.msra.mxu1 %v5794_v63  ;;  %5276 = vmatprep.subr.bf16.mxu0 %v5795_v5  ;;  %v5830_v5 = vld [vmem:[#allocation4 + $0x328] sm:$0xff]  }
 0x11a   :  { %v4974_v55 = vpop.f32.mrb[0].mxu0  ;;  %5298 = vmatprep.subr.bf16.mxu1 %v5796_v7  ;;  %v5831_v7 = vld [vmem:[#allocation4 + $0x2f0] sm:$0xff]  }
 0x11b   :  { %v4996_v57 = vpop.f32.mrb[0].mxu1  ;;  %v4975_v59 = vpop.f32.mrb[1].mxu0 }
 0x11c   :  { %v4976_v61 = vadd.f32 %v4975_v59, %v4974_v55  ;;  %v4997_v62 = vpop.f32.mrb[1].mxu1  ;;  %v4977_v2 = vpop.f32.mrb[2].mxu0  ;;  %5277 = vmatpush3.bf16.msra.mxu0 %v5797_v10  ;;  %v5825_v55 = vld [vmem:[#allocation4 + $0x2a0] sm:$0xff]   ;;  %v5834_v10 = vld [vmem:[#allocation4 + $0x330] sm:$0xff]  }
 0x11d   :  { %v4998_v1 = vadd.f32 %v4997_v62, %v4996_v57  ;;  %v4999_v3 = vpop.f32.mrb[2].mxu1  ;;  %v4978_v6 = vpop.f32.mrb[3].mxu0  ;;  %5299 = vmatpush3.bf16.msra.mxu1 %v5798_v11  ;;  %5278 = vmatprep.subr.bf16.mxu0 %v5799_v13  ;;  %v5826_v57 = vld [vmem:[#allocation4 + $0x320] sm:$0xff]   ;;  %v5829_v2 = vld [vmem:[#allocation4 + $0x2a8] sm:$0xff]   ;;  %v5999_v11 = vld [vmem:[%s6470_s0 + $0x50] sm:$0xff] }
 0x11e   :  { %v5000_v8 = vpop.f32.mrb[3].mxu1  ;;  %v1586_v9 = vadd.f32 %v4976_v61, %v494_v4  ;;  %5300 = vmatprep.subr.bf16.mxu1 %v5800_v14  ;;  %v5827_v61 = vld [vmem:[#allocation4 + $0x2e8] sm:$0xff]   ;;  %v5835_v13 = vld [vmem:[#allocation4 + $0x2f8] sm:$0xff]   ;;  %v6000_v14 = vld [vmem:[%s6470_s0 + $0x60] sm:$0xff] }
 0x11f   :  { %v5832_v8 = vld [vmem:[#allocation4 + $0x370] sm:$0xff]  }
 0x120   :  { %v6217_v12 = vadd.f32 %v4998_v1, %v1586_v9  ;;  %5279 = vmatpush3.bf16.msra.mxu0 %v5801_v15  ;;  %v5833_v9 = vld [vmem:[#allocation4 + $0x2b0] sm:$0xff]   ;;  %v107_v15 = vmul.f32 %v6000_v14, %v6000_v14  ;;  %v6006_v14 = vld [vmem:[%s6470_s0 + $0xa8] sm:$0xff] }
 0x121   :  { %5301 = vmatpush3.bf16.msra.mxu1 %v5802_v16  ;;  %5280 = vmatprep.subr.bf16.mxu0 %v5803_v19  ;;  %v5836_v16 = vld [vmem:[#allocation4 + $0x378] sm:$0xff]  }
 0x122   :  { %5302 = vmatprep.subr.bf16.mxu1 %v5804_v22  ;;  %v5837_v19 = vld [vmem:[#allocation4 + $0x2b8] sm:$0xff]   ;;  %v129_v24 = vpack.c.bf16 %v107_v15, %v107_v15  ;;  %v116_v15 = vmul.f32 %v6006_v14, %v6006_v14 }
 0x123   :  { %v5838_v22 = vld [vmem:[#allocation4 + $0x338] sm:$0xff]  }
 0x124   :  { %5281 = vmatpush3.bf16.msra.mxu0 %v5805_v25  ;;  %v5839_v25 = vld [vmem:[#allocation4 + $0x3c0] sm:$0xff]  }
 0x125   :  { %5303 = vmatpush3.bf16.msra.mxu1 %v5806_v28  ;;  %5310 = vmatprep.subr.bf16.mxu0 %v5807_v31  ;;  %v5841_v28 = vld [vmem:[#allocation4 + $0x380] sm:$0xff]   ;;  %v5843_v31 = vld [vmem:[#allocation4 + $0x3c8] sm:$0xff]  }
 0x126   :  { %5332 = vmatprep.subr.bf16.mxu1 %v5808_v32  ;;  %v5844_v32 = vld [vmem:[#allocation4 + $0x448] sm:$0xff]  }
 0x127   :  { %3556 = vmatmul.mubr.bf16.vlgmr.msra.gmra.mrb[28].mxu0 %v123_v29  ;;  %v134_v29 = vpack.c.bf16 %v112_v21, %v112_v21 }
 0x128   :  { %3596 = vmatmul.mubr.bf16.vlgmr.msra.gmra.mrb[28].mxu1 %v125_v30  ;;  %5311 = vmatpush3.bf16.msra.mxu0 %v5809_v34  ;;  %v5842_v30 = vld [vmem:[#allocation4 + $0x400] sm:$0xff]   ;;  %v5846_v34 = vld [vmem:[#allocation4 + $0x408] sm:$0xff]  }
 0x129   :  { %5333 = vmatpush3.bf16.msra.mxu1 %v5810_v36  ;;  %3635 = vmatprep.mubr.bf16.mxu0 %v128_v33  ;;  %v5845_v33 = vld [vmem:[#allocation4 + $0x388] sm:$0xff]   ;;  %v5848_v36 = vld [vmem:[#allocation4 + $0x450] sm:$0xff]  }
 0x12a   :  { %5312 = vmatprep.subr.bf16.mxu0 %v5811_v37  ;;  %3675 = vmatprep.mubr.bf16.mxu1 %v130_v35  ;;  %v5847_v35 = vld [vmem:[#allocation4 + $0x3d0] sm:$0xff]  }
 0x12b   :  { %5334 = vmatprep.subr.bf16.mxu1 %v5812_v38  ;;  %v5849_v37 = vld [vmem:[#allocation4 + $0x390] sm:$0xff]  }
 0x12c   :  { %5313 = vmatpush3.bf16.msra.mxu0 %v5813_v39  ;;  %v5850_v38 = vld [vmem:[#allocation4 + $0x410] sm:$0xff]   ;;  %v5851_v39 = vld [vmem:[#allocation4 + $0x3d8] sm:$0xff]  }
 0x12d   :  { %5335 = vmatpush3.bf16.msra.mxu1 %v5814_v40  ;;  %5314 = vmatprep.subr.bf16.mxu0 %v5815_v41  ;;  %v5852_v40 = vld [vmem:[#allocation4 + $0x458] sm:$0xff]  }
 0x12e   :  { %5336 = vmatprep.subr.bf16.mxu1 %v5816_v42  ;;  %v5853_v41 = vld [vmem:[#allocation4 + $0x398] sm:$0xff]  }
 0x12f   :  { %v5854_v42 = vld [vmem:[#allocation4 + $0x418] sm:$0xff]  }
 0x130   :  { %5315 = vmatpush3.bf16.msra.mxu0 %v5817_v43  ;;  %v5855_v43 = vld [vmem:[#allocation4 + $0x3e0] sm:$0xff]  }
 0x131   :  { %5337 = vmatpush3.bf16.msra.mxu1 %v5818_v44  ;;  %5316 = vmatprep.subr.bf16.mxu0 %v5819_v45  ;;  %v5856_v44 = vld [vmem:[#allocation4 + $0x460] sm:$0xff]  }
 0x132   :  { %5338 = vmatprep.subr.bf16.mxu1 %v5820_v46  ;;  %v5857_v46 = vld [vmem:[#allocation4 + $0x3a0] sm:$0xff]  }
 0x134   :  { %5317 = vmatpush3.bf16.msra.mxu0 %v5821_v47 }
 0x135   :  { %5339 = vmatpush3.bf16.msra.mxu1 %v5822_v49  ;;  %5318 = vmatprep.subr.bf16.mxu0 %v5823_v50  ;;  %v5858_v49 = vld [vmem:[#allocation4 + $0x420] sm:$0xff]  }
 0x136   :  { %5340 = vmatprep.subr.bf16.mxu1 %v5824_v52  ;;  %v5859_v52 = vld [vmem:[#allocation4 + $0x3e8] sm:$0xff]  }
 0x138   :  { %5319 = vmatpush3.bf16.msra.mxu0 %v5825_v55 }
 0x139   :  { %5341 = vmatpush3.bf16.msra.mxu1 %v5826_v57  ;;  %5320 = vmatprep.subr.bf16.mxu0 %v5827_v61  ;;  %v5862_v61 = vld [vmem:[#allocation4 + $0x428] sm:$0xff]  }
 0x13a   :  { %v5018_v51 = vpop.f32.mrb[4].mxu0  ;;  %5342 = vmatprep.subr.bf16.mxu1 %v5828_v0  ;;  %v5863_v0 = vld [vmem:[#allocation4 + $0x3f0] sm:$0xff]  }
 0x13b   :  { %v5040_v54 = vpop.f32.mrb[4].mxu1  ;;  %v5019_v56 = vpop.f32.mrb[5].mxu0 }
 0x13c   :  { %v5020_v58 = vadd.f32 %v5019_v56, %v5018_v51  ;;  %v5041_v59 = vpop.f32.mrb[5].mxu1  ;;  %v5021_v62 = vpop.f32.mrb[6].mxu0  ;;  %5321 = vmatpush3.bf16.msra.mxu0 %v5829_v2  ;;  %v5860_v56 = vld [vmem:[#allocation4 + $0x468] sm:$0xff]   ;;  %v5864_v2 = vld [vmem:[#allocation4 + $0x470] sm:$0xff]  }
 0x13d   :  { %v5042_v60 = vadd.f32 %v5041_v59, %v5040_v54  ;;  %v5043_v1 = vpop.f32.mrb[6].mxu1  ;;  %v5022_v3 = vpop.f32.mrb[7].mxu0  ;;  %5343 = vmatpush3.bf16.msra.mxu1 %v5830_v5  ;;  %5322 = vmatprep.subr.bf16.mxu0 %v5831_v7  ;;  %v5861_v59 = vld [vmem:[#allocation4 + $0x3a8] sm:$0xff]   ;;  %v5866_v5 = vld [vmem:[#allocation4 + $0x430] sm:$0xff]  }
 0x13e   :  { %v1666_v63 = vadd.f32 %v5020_v58, %v6217_v12  ;;  %v5044_v6 = vpop.f32.mrb[7].mxu1  ;;  %5344 = vmatprep.subr.bf16.mxu1 %v5832_v8  ;;  %v105_v12 = vmul.f32 %v5999_v11, %v5999_v11  ;;  %v5865_v3 = vld [vmem:[#allocation4 + $0x3b0] sm:$0xff]   ;;  %v6004_v8 = vld [vmem:[%s6470_s0 + $0x80] sm:$0xff]  ;;  %v6005_v11 = vld [vmem:[%s6470_s0 + $0x98] sm:$0xff] }
 0x13f   :  { %v6003_v6 = vld [vmem:[%s6470_s0 + $0x70] sm:$0xff] }
 0x140   :  { %v6232_v4 = vadd.f32 %v5042_v60, %v1666_v63  ;;  %5323 = vmatpush3.bf16.msra.mxu0 %v5833_v9  ;;  %v127_v23 = vpack.c.bf16 %v105_v12, %v105_v12  ;;  %v109_v7 = vmul.f32 %v6003_v6, %v6003_v6  ;;  %v111_v9 = vmul.f32 %v6004_v8, %v6004_v8  ;;  %v5901_v6 = vld [vmem:[#allocation4 + $0x4b8] sm:$0xff]  }
 0x141   :  { %5345 = vmatpush3.bf16.msra.mxu1 %v5834_v10  ;;  %5324 = vmatprep.subr.bf16.mxu0 %v5835_v13  ;;  %v5868_v10 = vld [vmem:[#allocation4 + $0x478] sm:$0xff]   ;;  %v114_v12 = vmul.f32 %v6005_v11, %v6005_v11 }
 0x142   :  { %5346 = vmatprep.subr.bf16.mxu1 %v5836_v16  ;;  %v5869_v13 = vld [vmem:[#allocation4 + $0x3b8] sm:$0xff]   ;;  %v131_v17 = vpack.c.bf16 %v109_v7, %v109_v7  ;;  %v133_v18 = vpack.c.bf16 %v111_v9, %v111_v9 }
 0x143   :  { %v5870_v16 = vld [vmem:[#allocation4 + $0x438] sm:$0xff]   ;;  %v136_v21 = vpack.c.bf16 %v114_v12, %v114_v12 }
 0x144   :  { %5325 = vmatpush3.bf16.msra.mxu0 %v5837_v19  ;;  %v5871_v19 = vld [vmem:[#allocation4 + $0x4c0] sm:$0xff]   ;;  %v5902_v7 = vld [vmem:[#allocation4 + $0x538] sm:$0xff]  }
 0x145   :  { %5347 = vmatpush3.bf16.msra.mxu1 %v5838_v22  ;;  %5354 = vmatprep.subr.bf16.mxu0 %v5839_v25  ;;  %v5873_v22 = vld [vmem:[#allocation4 + $0x480] sm:$0xff]   ;;  %v5875_v25 = vld [vmem:[#allocation4 + $0x4c8] sm:$0xff]  }
 0x146   :  { %5376 = vmatprep.subr.bf16.mxu1 %v5840_v26  ;;  %v5876_v26 = vld [vmem:[#allocation4 + $0x548] sm:$0xff]  }
 0x147   :  { %3636 = vmatmul.mubr.bf16.vlgmr.msra.gmra.mrb[32].mxu0 %v127_v23  ;;  %v138_v23 = vpack.c.bf16 %v116_v15, %v116_v15 }
 0x148   :  { %3676 = vmatmul.mubr.bf16.vlgmr.msra.gmra.mrb[32].mxu1 %v129_v24  ;;  %5355 = vmatpush3.bf16.msra.mxu0 %v5841_v28  ;;  %v5874_v24 = vld [vmem:[#allocation4 + $0x500] sm:$0xff]   ;;  %v5878_v28 = vld [vmem:[#allocation4 + $0x508] sm:$0xff]  }
 0x149   :  { %5377 = vmatpush3.bf16.msra.mxu1 %v5842_v30  ;;  %3715 = vmatprep.mubr.bf16.mxu0 %v132_v27  ;;  %v5877_v27 = vld [vmem:[#allocation4 + $0x488] sm:$0xff]   ;;  %v5880_v30 = vld [vmem:[#allocation4 + $0x550] sm:$0xff]  }
 0x14a   :  { %5356 = vmatprep.subr.bf16.mxu0 %v5843_v31  ;;  %3755 = vmatprep.mubr.bf16.mxu1 %v134_v29  ;;  %v5879_v29 = vld [vmem:[#allocation4 + $0x4d0] sm:$0xff]  }
 0x14b   :  { %5378 = vmatprep.subr.bf16.mxu1 %v5844_v32  ;;  %v5881_v31 = vld [vmem:[#allocation4 + $0x490] sm:$0xff]  }
 0x14c   :  { %5357 = vmatpush3.bf16.msra.mxu0 %v5845_v33  ;;  %v5882_v32 = vld [vmem:[#allocation4 + $0x510] sm:$0xff]   ;;  %v5883_v33 = vld [vmem:[#allocation4 + $0x4d8] sm:$0xff]  }
 0x14d   :  { %5379 = vmatpush3.bf16.msra.mxu1 %v5846_v34  ;;  %5358 = vmatprep.subr.bf16.mxu0 %v5847_v35  ;;  %v5884_v34 = vld [vmem:[#allocation4 + $0x558] sm:$0xff]  }
 0x14e   :  { %5380 = vmatprep.subr.bf16.mxu1 %v5848_v36  ;;  %v5885_v35 = vld [vmem:[#allocation4 + $0x498] sm:$0xff]  }
 0x14f   :  { %v5886_v36 = vld [vmem:[#allocation4 + $0x518] sm:$0xff]  }
 0x150   :  { %5359 = vmatpush3.bf16.msra.mxu0 %v5849_v37  ;;  %v5887_v37 = vld [vmem:[#allocation4 + $0x4e0] sm:$0xff]  }
 0x151   :  { %5381 = vmatpush3.bf16.msra.mxu1 %v5850_v38  ;;  %5360 = vmatprep.subr.bf16.mxu0 %v5851_v39  ;;  %v5888_v38 = vld [vmem:[#allocation4 + $0x560] sm:$0xff]  }
 0x152   :  { %5382 = vmatprep.subr.bf16.mxu1 %v5852_v40  ;;  %v5889_v39 = vld [vmem:[#allocation4 + $0x4a0] sm:$0xff]  }
 0x153   :  { %v5890_v40 = vld [vmem:[#allocation4 + $0x520] sm:$0xff]  }
 0x154   :  { %5361 = vmatpush3.bf16.msra.mxu0 %v5853_v41 }
 0x155   :  { %5383 = vmatpush3.bf16.msra.mxu1 %v5854_v42  ;;  %5362 = vmatprep.subr.bf16.mxu0 %v5855_v43  ;;  %v5891_v43 = vld [vmem:[#allocation4 + $0x4e8] sm:$0xff]  }
 0x156   :  { %5384 = vmatprep.subr.bf16.mxu1 %v5856_v44 }
 0x158   :  { %5363 = vmatpush3.bf16.msra.mxu0 %v5857_v46 }
 0x159   :  { %5385 = vmatpush3.bf16.msra.mxu1 %v5858_v49  ;;  %5364 = vmatprep.subr.bf16.mxu0 %v5859_v52  ;;  %v5892_v49 = vld [vmem:[#allocation4 + $0x568] sm:$0xff]  }
 0x15a   :  { %v5062_v45 = vpop.f32.mrb[8].mxu0  ;;  %5386 = vmatprep.subr.bf16.mxu1 %v5860_v56  ;;  %v5893_v52 = vld [vmem:[#allocation4 + $0x4a8] sm:$0xff]  }
 0x15b   :  { %v5084_v47 = vpop.f32.mrb[8].mxu1  ;;  %v5063_v50 = vpop.f32.mrb[9].mxu0 }
 0x15c   :  { %v5085_v51 = vpop.f32.mrb[9].mxu1  ;;  %v5064_v54 = vadd.f32 %v5063_v50, %v5062_v45  ;;  %v5065_v57 = vpop.f32.mrb[10].mxu0  ;;  %5365 = vmatpush3.bf16.msra.mxu0 %v5861_v59 }
 0x15d   :  { %v5086_v55 = vadd.f32 %v5085_v51, %v5084_v47  ;;  %v5087_v58 = vpop.f32.mrb[10].mxu1  ;;  %v5066_v62 = vpop.f32.mrb[11].mxu0  ;;  %5387 = vmatpush3.bf16.msra.mxu1 %v5862_v61  ;;  %5366 = vmatprep.subr.bf16.mxu0 %v5863_v0  ;;  %v5897_v61 = vld [vmem:[#allocation4 + $0x4b0] sm:$0xff]  }
 0x15e   :  { %v1746_v60 = vadd.f32 %v5064_v54, %v6232_v4  ;;  %v5088_v63 = vpop.f32.mrb[11].mxu1  ;;  %5388 = vmatprep.subr.bf16.mxu1 %v5864_v2  ;;  %v5867_v4 = vld [vmem:[#allocation4 + $0x3f8] sm:$0xff]   ;;  %v5895_v58 = vld [vmem:[#allocation4 + $0x4f0] sm:$0xff]   ;;  %v6008_v2 = vld [vmem:[%s6470_s0 + $0xa0] sm:$0xff] }
 0x15f   :  { %v5898_v62 = vld [vmem:[#allocation4 + $0x530] sm:$0xff]  }
 0x160   :  { %v6247_v1 = vadd.f32 %v5086_v55, %v1746_v60  ;;  %5367 = vmatpush3.bf16.msra.mxu0 %v5865_v3  ;;  %v5894_v55 = vld [vmem:[#allocation4 + $0x528] sm:$0xff]   ;;  %v5896_v60 = vld [vmem:[#allocation4 + $0x570] sm:$0xff]   ;;  %v115_v3 = vmul.f32 %v6008_v2, %v6008_v2 }
 0x161   :  { %5389 = vmatpush3.bf16.msra.mxu1 %v5866_v5  ;;  %5368 = vmatprep.subr.bf16.mxu0 %v5867_v4  ;;  %v6007_v63 = vld [vmem:[%s6470_s0 + $0x90] sm:$0xff]  ;;  %v5900_v5 = vld [vmem:[#allocation4 + $0x578] sm:$0xff]  }
 0x162   :  { %5390 = vmatprep.subr.bf16.mxu1 %v5868_v10  ;;  %v113_v0 = vmul.f32 %v6007_v63, %v6007_v63  ;;  %v137_v8 = vpack.c.bf16 %v115_v3, %v115_v3 }
 0x164   :  { %5369 = vmatpush3.bf16.msra.mxu0 %v5869_v13  ;;  %v135_v4 = vpack.c.bf16 %v113_v0, %v113_v0 }
 0x165   :  { %5391 = vmatpush3.bf16.msra.mxu1 %v5870_v16  ;;  %5398 = vmatprep.subr.bf16.mxu0 %v5871_v19 }
 0x166   :  { %5420 = vmatprep.subr.bf16.mxu1 %v5872_v20 }
 0x167   :  { %3716 = vmatmul.mubr.bf16.vlgmr.msra.gmra.mrb[36].mxu0 %v131_v17 }
 0x168   :  { %3756 = vmatmul.mubr.bf16.vlgmr.msra.gmra.mrb[36].mxu1 %v133_v18  ;;  %5399 = vmatpush3.bf16.msra.mxu0 %v5873_v22 }
 0x169   :  { %5421 = vmatpush3.bf16.msra.mxu1 %v5874_v24  ;;  %3795 = vmatprep.mubr.bf16.mxu0 %v136_v21 }
 0x16a   :  { %5400 = vmatprep.subr.bf16.mxu0 %v5875_v25  ;;  %3835 = vmatprep.mubr.bf16.mxu1 %v138_v23 }
 0x16b   :  { %5422 = vmatprep.subr.bf16.mxu1 %v5876_v26 }
 0x16c   :  { %5401 = vmatpush3.bf16.msra.mxu0 %v5877_v27 }
 0x16d   :  { %5423 = vmatpush3.bf16.msra.mxu1 %v5878_v28  ;;  %5402 = vmatprep.subr.bf16.mxu0 %v5879_v29 }
 0x16e   :  { %5424 = vmatprep.subr.bf16.mxu1 %v5880_v30 }
 0x170   :  { %5403 = vmatpush3.bf16.msra.mxu0 %v5881_v31 }
 0x171   :  { %5425 = vmatpush3.bf16.msra.mxu1 %v5882_v32  ;;  %5404 = vmatprep.subr.bf16.mxu0 %v5883_v33  ;;  %v2345_v32 = vsub.s32 1, %v6209_v48  ;;  %v6274_v33 = vld [vmem:[%s6474_s4] sm:$0xff] }
 0x172   :  { %5426 = vmatprep.subr.bf16.mxu1 %v5884_v34 }
 0x173   :  { %v2346_v34 = vrot.slane %v6274_v33, %v2345_v32 }
 0x174   :  { %5405 = vmatpush3.bf16.msra.mxu0 %v5885_v35 }
 0x175   :  { %5427 = vmatpush3.bf16.msra.mxu1 %v5886_v36  ;;  %5406 = vmatprep.subr.bf16.mxu0 %v5887_v37 }
 0x176   :  { %5428 = vmatprep.subr.bf16.mxu1 %v5888_v38 }
 0x178   :  { %5407 = vmatpush3.bf16.msra.mxu0 %v5889_v39 }
 0x179   :  { %5429 = vmatpush3.bf16.msra.mxu1 %v5890_v40  ;;  %5408 = vmatprep.subr.bf16.mxu0 %v5891_v43 }
 0x17a   :  { %v5106_v41 = vpop.f32.mrb[12].mxu0  ;;  %5430 = vmatprep.subr.bf16.mxu1 %v5892_v49  ;;  %v5903_v49 = vld [vmem:[%s6473_s3] ss:$8 sps:$4 sm:$0xff]  }
 0x17b   :  { %v5128_v42 = vpop.f32.mrb[12].mxu1  ;;  %v5107_v44 = vpop.f32.mrb[13].mxu0 }
 0x17c   :  { %v5129_v45 = vpop.f32.mrb[13].mxu1  ;;  %v5108_v46 = vadd.f32 %v5107_v44, %v5106_v41  ;;  %v5109_v50 = vpop.f32.mrb[14].mxu0  ;;  %5409 = vmatpush3.bf16.msra.mxu0 %v5893_v52  ;;  %v5905_v52 = vld [vmem:[%s6473_s3 + $0x10] ss:$8 sps:$4 sm:$0xff]  }
 0x17d   :  { %v5130_v47 = vadd.f32 %v5129_v45, %v5128_v42  ;;  %v5131_v51 = vpop.f32.mrb[14].mxu1  ;;  %v5110_v56 = vpop.f32.mrb[15].mxu0  ;;  %5431 = vmatpush3.bf16.msra.mxu1 %v5894_v55  ;;  %5410 = vmatprep.subr.bf16.mxu0 %v5895_v58  ;;  %v6062_v50 = vmov 0.0  }
 0x17e   :  { %v1826_v54 = vadd.f32 %v5108_v46, %v6247_v1  ;;  %v5132_v57 = vpop.f32.mrb[15].mxu1  ;;  %5432 = vmatprep.subr.bf16.mxu1 %v5896_v60  ;;  %v5899_v1 = vld [vmem:[#allocation4 + $0x4f8] sm:$0xff]   ;;  %v5904_v51 = vld [vmem:[%s6473_s3 + $0x100] ss:$8 sps:$4 sm:$0xff]  }
 0x17f   :  { %v5907_v56 = vld [vmem:[%s6473_s3 + $0x110] ss:$8 sps:$4 sm:$0xff]  }
 0x180   :  { %v1866_v59 = vadd.f32 %v5130_v47, %v1826_v54  ;;  %5411 = vmatpush3.bf16.msra.mxu0 %v5897_v61  ;;  %v5906_v54 = vld [vmem:[%s6473_s3 + $0x80] ss:$8 sps:$4 sm:$0xff]   ;;  %v5909_v60 = vld [vmem:[%s6473_s3 + $0x90] ss:$8 sps:$4 sm:$0xff]  }
 0x181   :  { %5433 = vmatpush3.bf16.msra.mxu1 %v5898_v62  ;;  %5412 = vmatprep.subr.bf16.mxu0 %v5899_v1 }
 0x182   :  { %5434 = vmatprep.subr.bf16.mxu1 %v5900_v5 }
 0x184   :  { %5413 = vmatpush3.bf16.msra.mxu0 %v5901_v6  ;;  %v5910_v6 = vld [vmem:[%s6473_s3 + $0x120] ss:$8 sps:$4 sm:$0xff]  }
 0x185   :  { %5435 = vmatpush3.bf16.msra.mxu1 %v5902_v7  ;;  %5504 = vmatprep.subr.bf16.mxu0 %v6062_v50  ;;  %v5911_v7 = vld [vmem:[%s6473_s3 + $0x30] ss:$8 sps:$4 sm:$0xff]  }
 0x186   :  { %5451 = vmatprep.subr.bf16.mxu1 %v5904_v51 }
 0x187   :  { %3796 = vmatmul.mubr.bf16.vlgmr.msra.gmra.mrb[40].mxu0 %v135_v4  ;;  %v5912_v4 = vld [vmem:[%s6473_s3 + $0xa0] ss:$8 sps:$4 sm:$0xff]  }
 0x188   :  { %3836 = vmatmul.mubr.bf16.vlgmr.msra.gmra.mrb[40].mxu1 %v137_v8  ;;  %5505 = vmatpush3.bf16.msra.mxu0 %v5903_v49 }
 0x189   :  { %5506 = vmatprep.subr.bf16.mxu0 %v6062_v50  ;;  %5452 = vmatpush3.bf16.msra.mxu1 %v5906_v54 }
 0x18a   :  { %5453 = vmatprep.subr.bf16.mxu1 %v5907_v56  ;;  %5520 = vmatprep.mubr.msk.bf16.mxu0 %vm6063_vm0, %v6062_v50 }
 0x18c   :  { %5507 = vmatpush3.bf16.msra.mxu0 %v5905_v52 }
 0x18d   :  { %5508 = vmatprep.subr.bf16.mxu0 %v6062_v50  ;;  %5454 = vmatpush3.bf16.msra.mxu1 %v5909_v60 }
 0x18e   :  { %5455 = vmatprep.subr.bf16.mxu1 %v5910_v6 }
 0x191   :  { %5456 = vmatpush3.bf16.msra.mxu1 %v5912_v4 }
 0x19a   :  { %v5150_v9 = vpop.f32.mrb[16].mxu0 }
 0x19b   :  { %v5172_v10 = vpop.f32.mrb[16].mxu1  ;;  %v5151_v11 = vpop.f32.mrb[17].mxu0 }
 0x19c   :  { %v5152_v12 = vadd.f32 %v5151_v11, %v5150_v9  ;;  %v5173_v13 = vpop.f32.mrb[17].mxu1  ;;  %v5153_v14 = vpop.f32.mrb[18].mxu0  ;;  %v5913_v9 = vld [vmem:[%s6473_s3 + $0x130] ss:$8 sps:$4 sm:$0xff]  }
 0x19d   :  { %v5174_v15 = vadd.f32 %v5173_v13, %v5172_v10  ;;  %v5175_v16 = vpop.f32.mrb[18].mxu1  ;;  %v5154_v17 = vpop.f32.mrb[19].mxu0  ;;  %v5914_v10 = vld [vmem:[%s6473_s3 + $0x40] ss:$8 sps:$4 sm:$0xff]   ;;  %v5915_v11 = vld [vmem:[%s6473_s3 + $0xb0] ss:$8 sps:$4 sm:$0xff]   ;;  %5457 = vmatprep.subr.bf16.mxu1 %v5913_v9 }
 0x19e   :  { %v1906_v18 = vadd.f32 %v5152_v12, %v1866_v59  ;;  %v5176_v19 = vpop.f32.mrb[19].mxu1  ;;  %v5908_v59 = vld [vmem:[%s6473_s3 + $0x20] ss:$8 sps:$4 sm:$0xff]   ;;  %5458 = vmatpush3.bf16.msra.mxu1 %v5915_v11  ;;  %v5917_v13 = vld [vmem:[%s6473_s3 + $0x50] ss:$8 sps:$4 sm:$0xff]  }
 0x19f   :  { %5509 = vmatpush3.bf16.msra.mxu0 %v5908_v59  ;;  %v5916_v12 = vld [vmem:[%s6473_s3 + $0x140] ss:$8 sps:$4 sm:$0xff]   ;;  %v5921_v17 = vld [vmem:[%s6473_s3 + $0xd0] ss:$8 sps:$4 sm:$0xff]  }
 0x1a0   :  { %v1946_v20 = vadd.f32 %v5174_v15, %v1906_v18  ;;  %5510 = vmatprep.subr.bf16.mxu0 %v6062_v50  ;;  %v5918_v14 = vld [vmem:[%s6473_s3 + $0xc0] ss:$8 sps:$4 sm:$0xff]   ;;  %5459 = vmatprep.subr.bf16.mxu1 %v5916_v12  ;;  %v5919_v15 = vld [vmem:[%s6473_s3 + $0x150] ss:$8 sps:$4 sm:$0xff]  }
 0x1a1   :  { %v5920_v16 = vld [vmem:[%s6473_s3 + $0x60] ss:$8 sps:$4 sm:$0xff]   ;;  %v5923_v19 = vld [vmem:[%s6473_s3 + $0x70] ss:$8 sps:$4 sm:$0xff]  }
 0x1a2   :  { %5460 = vmatpush3.bf16.msra.mxu1 %v5918_v14  ;;  %v5922_v18 = vld [vmem:[%s6473_s3 + $0x160] ss:$8 sps:$4 sm:$0xff]  }
 0x1a3   :  { %5511 = vmatpush3.bf16.msra.mxu0 %v5911_v7  ;;  %5461 = vmatprep.subr.bf16.mxu1 %v5919_v15 }
 0x1a4   :  { %5512 = vmatprep.subr.bf16.mxu0 %v6062_v50 }
 0x1a6   :  { %5462 = vmatpush3.bf16.msra.mxu1 %v5921_v17 }
 0x1a7   :  { %5513 = vmatpush3.bf16.msra.mxu0 %v5914_v10  ;;  %5463 = vmatprep.subr.bf16.mxu1 %v5922_v18 }
 0x1a8   :  { %5514 = vmatprep.subr.bf16.mxu0 %v6062_v50 }
 0x1ab   :  { %5515 = vmatpush3.bf16.msra.mxu0 %v5917_v13 }
 0x1ac   :  { %5516 = vmatprep.subr.bf16.mxu0 %v6062_v50 }
 0x1af   :  { %5517 = vmatpush3.bf16.msra.mxu0 %v5920_v16 }
 0x1b0   :  { %5518 = vmatprep.subr.bf16.mxu0 %v6062_v50 }
 0x1b3   :  { %5519 = vmatpush3.bf16.msra.mxu0 %v5923_v19 }
 0x1b4   :  { %5524 = vmatprep.subr.bf16.mxu0 %v6062_v50 }
 0x1ba   :  { %v5194_v21 = vpop.f32.mrb[20].mxu0 }
 0x1bb   :  { %v5216_v22 = vpop.f32.mrb[20].mxu1  ;;  %v5195_v23 = vpop.f32.mrb[21].mxu0 }
 0x1bc   :  { %v5196_v24 = vadd.f32 %v5195_v23, %v5194_v21  ;;  %v5217_v25 = vpop.f32.mrb[21].mxu1  ;;  %v5197_v26 = vpop.f32.mrb[22].mxu0  ;;  %v5925_v21 = vld [vmem:[%s6473_s3 + $0x170] ss:$8 sps:$4 sm:$0xff]  }
 0x1bd   :  { %v5218_v27 = vadd.f32 %v5217_v25, %v5216_v22  ;;  %v5219_v28 = vpop.f32.mrb[22].mxu1  ;;  %v5198_v29 = vpop.f32.mrb[23].mxu0  ;;  %v5926_v22 = vld [vmem:[%s6473_s3 + $0xf0] ss:$8 sps:$4 sm:$0xff]  }
 0x1be   :  { %v6268_v30 = vadd.f32 %v5196_v24, %v1946_v20  ;;  %v5220_v31 = vpop.f32.mrb[23].mxu1  ;;  %v5924_v20 = vld [vmem:[%s6473_s3 + $0xe0] ss:$8 sps:$4 sm:$0xff]  }
 0x1bf   :  { %v3438_v38 = vadd.f32 %v5218_v27, %v2346_v34  ;;  %5464 = vmatpush3.bf16.msra.mxu1 %v5924_v20 }
 0x1c0   :  { %5465 = vmatprep.subr.bf16.mxu1 %v5925_v21 }
 0x1c3   :  { %5466 = vmatpush3.bf16.msra.mxu1 %v5926_v22 }
 0x1da   :  { %v5238_v35 = vpop.f32.mrb[24].mxu0 }
 0x1db   :  { %v5260_v36 = vpop.f32.mrb[24].mxu1  ;;  %v5239_v37 = vpop.f32.mrb[25].mxu0 }
 0x1dc   :  { %v5240_v39 = vadd.f32 %v5239_v37, %v5238_v35  ;;  %v5261_v40 = vpop.f32.mrb[25].mxu1  ;;  %v5241_v41 = vpop.f32.mrb[26].mxu0 }
 0x1dd   :  { %v5262_v42 = vadd.f32 %v5261_v40, %v5260_v36  ;;  %v5263_v43 = vpop.f32.mrb[26].mxu1  ;;  %v5242_v44 = vpop.f32.mrb[27].mxu0 }
 0x1de   :  { %v3478_v45 = vadd.f32 %v5240_v39, %v3438_v38  ;;  %v5264_v46 = vpop.f32.mrb[27].mxu1 }
 0x1e0   :  { %v3518_v47 = vadd.f32 %v5262_v42, %v3478_v45 }
 0x1fa   :  { %v5282_v55 = vpop.f32.mrb[28].mxu0 }
 0x1fb   :  { %v5304_v57 = vpop.f32.mrb[28].mxu1  ;;  %v5283_v58 = vpop.f32.mrb[29].mxu0 }
 0x1fc   :  { %v5284_v61 = vadd.f32 %v5283_v58, %v5282_v55  ;;  %v5305_v62 = vpop.f32.mrb[29].mxu1  ;;  %v5285_v63 = vpop.f32.mrb[30].mxu0 }
 0x1fd   :  { %v5306_v0 = vadd.f32 %v5305_v62, %v5304_v57  ;;  %v5307_v1 = vpop.f32.mrb[30].mxu1  ;;  %v5286_v2 = vpop.f32.mrb[31].mxu0 }
 0x1fe   :  { %v3558_v3 = vadd.f32 %v5284_v61, %v3518_v47  ;;  %v5308_v5 = vpop.f32.mrb[31].mxu1  ;;  %v3854_v2 = vmul.f32 %v6268_v30, %v6268_v30 }
 0x1ff   :  { %v3846_v5 = vmul.f32 1.5957692, %v6268_v30 }
 0x200   :  { %v3598_v8 = vadd.f32 %v5306_v0, %v3558_v3  ;;  %v3855_v4 = vmul.f32 -0.5, %v3854_v2 }
 0x21a   :  { %v5326_v23 = vpop.f32.mrb[32].mxu0 }
 0x21b   :  { %v5348_v24 = vpop.f32.mrb[32].mxu1  ;;  %v5327_v25 = vpop.f32.mrb[33].mxu0 }
 0x21c   :  { %v5328_v26 = vadd.f32 %v5327_v25, %v5326_v23  ;;  %v5349_v27 = vpop.f32.mrb[33].mxu1  ;;  %v5329_v28 = vpop.f32.mrb[34].mxu0 }
 0x21d   :  { %v5350_v29 = vadd.f32 %v5349_v27, %v5348_v24  ;;  %v5351_v31 = vpop.f32.mrb[34].mxu1  ;;  %v5330_v34 = vpop.f32.mrb[35].mxu0 }
 0x21e   :  { %v3638_v35 = vadd.f32 %v5328_v26, %v3598_v8  ;;  %v5352_v36 = vpop.f32.mrb[35].mxu1  ;;  %v5927_v31 = vld [vmem:[%s6473_s3 + $0x4] ss:$8 sps:$4 sm:$0xff]   ;;  %v5929_v34 = vld [vmem:[%s6473_s3 + $0x14] ss:$8 sps:$4 sm:$0xff]  }
 0x21f   :  { %v5931_v36 = vld [vmem:[%s6473_s3 + $0x114] ss:$8 sps:$4 sm:$0xff]  }
 0x220   :  { %v3678_v37 = vadd.f32 %v5350_v29, %v3638_v35  ;;  %v5930_v35 = vld [vmem:[%s6473_s3 + $0x84] ss:$8 sps:$4 sm:$0xff]  }
 0x23a   :  { %v5370_v38 = vpop.f32.mrb[36].mxu0 }
 0x23b   :  { %v5392_v39 = vpop.f32.mrb[36].mxu1  ;;  %v5371_v40 = vpop.f32.mrb[37].mxu0 }
 0x23c   :  { %v5372_v41 = vadd.f32 %v5371_v40, %v5370_v38  ;;  %v5393_v42 = vpop.f32.mrb[37].mxu1  ;;  %v5373_v43 = vpop.f32.mrb[38].mxu0  ;;  %v5933_v38 = vld [vmem:[%s6473_s3 + $0x94] ss:$8 sps:$4 sm:$0xff]  }
 0x23d   :  { %v5394_v44 = vadd.f32 %v5393_v42, %v5392_v39  ;;  %v5395_v45 = vpop.f32.mrb[38].mxu1  ;;  %v5374_v46 = vpop.f32.mrb[39].mxu0  ;;  %v5934_v39 = vld [vmem:[%s6473_s3 + $0x124] ss:$8 sps:$4 sm:$0xff]   ;;  %v5935_v40 = vld [vmem:[%s6473_s3 + $0x34] ss:$8 sps:$4 sm:$0xff]  }
 0x23e   :  { %v3718_v47 = vadd.f32 %v5372_v41, %v3678_v37  ;;  %v5396_v49 = vpop.f32.mrb[39].mxu1  ;;  %v5932_v37 = vld [vmem:[%s6473_s3 + $0x24] ss:$8 sps:$4 sm:$0xff]   ;;  %v5937_v42 = vld [vmem:[%s6473_s3 + $0x134] ss:$8 sps:$4 sm:$0xff]  }
 0x23f   :  { %v5936_v41 = vld [vmem:[%s6473_s3 + $0xa4] ss:$8 sps:$4 sm:$0xff]   ;;  %v5941_v46 = vld [vmem:[%s6473_s3 + $0x54] ss:$8 sps:$4 sm:$0xff]  }
 0x240   :  { %v3758_v51 = vadd.f32 %v5394_v44, %v3718_v47  ;;  %v5938_v43 = vld [vmem:[%s6473_s3 + $0x44] ss:$8 sps:$4 sm:$0xff]   ;;  %v5939_v44 = vld [vmem:[%s6473_s3 + $0xb4] ss:$8 sps:$4 sm:$0xff]  }
 0x241   :  { %v5940_v45 = vld [vmem:[%s6473_s3 + $0x144] ss:$8 sps:$4 sm:$0xff]   ;;  %v5943_v49 = vld [vmem:[%s6473_s3 + $0x154] ss:$8 sps:$4 sm:$0xff]  }
 0x242   :  { %v5942_v47 = vld [vmem:[%s6473_s3 + $0xc4] ss:$8 sps:$4 sm:$0xff]  }
 0x25a   :  { %v5414_v52 = vpop.f32.mrb[40].mxu0 }
 0x25b   :  { %v5436_v54 = vpop.f32.mrb[40].mxu1  ;;  %v5415_v55 = vpop.f32.mrb[41].mxu0 }
 0x25c   :  { %v5416_v56 = vadd.f32 %v5415_v55, %v5414_v52  ;;  %v5437_v57 = vpop.f32.mrb[41].mxu1  ;;  %v5417_v58 = vpop.f32.mrb[42].mxu0  ;;  %v5945_v52 = vld [vmem:[%s6473_s3 + $0xd4] ss:$8 sps:$4 sm:$0xff]  }
 0x25d   :  { %v5438_v59 = vadd.f32 %v5437_v57, %v5436_v54  ;;  %v5439_v60 = vpop.f32.mrb[42].mxu1  ;;  %v5418_v61 = vpop.f32.mrb[43].mxu0  ;;  %v5946_v54 = vld [vmem:[%s6473_s3 + $0x164] ss:$8 sps:$4 sm:$0xff]   ;;  %v5947_v55 = vld [vmem:[%s6473_s3 + $0x74] ss:$8 sps:$4 sm:$0xff]  }
 0x25e   :  { %v3798_v62 = vadd.f32 %v5416_v56, %v3758_v51  ;;  %v5440_v63 = vpop.f32.mrb[43].mxu1  ;;  %v5944_v51 = vld [vmem:[%s6473_s3 + $0x64] ss:$8 sps:$4 sm:$0xff]   ;;  %v5949_v57 = vld [vmem:[%s6473_s3 + $0x174] ss:$8 sps:$4 sm:$0xff]   ;;  %v4014_v61 = vsub.s32 3, %v6209_v48 }
 0x25f   :  { %v5948_v56 = vld [vmem:[%s6473_s3 + $0xe4] ss:$8 sps:$4 sm:$0xff]   ;;  %v5950_v58 = vld [vmem:[%s6473_s3 + $0xf4] ss:$8 sps:$4 sm:$0xff]  }
 0x260   :  { %v3838_v0 = vadd.f32 %v5438_v59, %v3798_v62  ;;  %v3890_v59 = vsub.s32 2, %v6209_v48 }
 0x262   :  { %v3843_v1 = vmax.f32 %v3838_v0, 1e-06 }
 0x264   :  { %5951 = vrsqrt.f32 %v3843_v1  ;;  %v3863_v3 = vadd.f32 %v3854_v2, %v3843_v1  ;;  %v4015_v2 = vrot.slane %v6274_v33, %v4014_v61 }
 0x26e   :  { %v5952_v6 = vpop.eup %5951 }
 0x26f   :  { %v3847_v7 = vmul.f32 %v5952_v6, %v3846_v5  ;;  %v3856_v8 = vmul.f32 %v5952_v6, %v5952_v6  ;;  %v3845_v13 = vmul.f32 %v5952_v6, %v3843_v1 }
 0x271   :  { %v3848_v9 = vsub.f32 0.0, %v3847_v7  ;;  %v3857_v10 = vmul.f32 %v3856_v8, %v3855_v4  ;;  %v3853_v15 = vmul.f32 0.3989423, %v3845_v13 }
 0x273   :  { %v3849_v11 = vmul.f32 1.442695, %v3848_v9  ;;  %v3858_v12 = vmul.f32 1.442695, %v3857_v10 }
 0x275   :  { %5953 = vpow2.f32 %v3849_v11 }
 0x276   :  { %5955 = vpow2.f32 %v3858_v12 }
 0x27f   :  { %v5954_v14 = vpop.eup %5953 }
 0x280   :  { %v5956_v16 = vpop.eup %5955  ;;  %v3851_v17 = vadd.f32 1.0, %v5954_v14 }
 0x281   :  { %v3860_v18 = vmul.f32 %v5956_v16, %v3853_v15 }
 0x282   :  { %5957 = vrcp.f32 %v3851_v17 }
 0x283   :  { %v3865_v19 = vmul.f32 %v3860_v18, %v6268_v30 }
 0x28c   :  { %v5958_v20 = vpop.eup %5957 }
 0x28d   :  { %v3864_v21 = vmul.f32 %v5958_v20, %v3863_v3  ;;  %v3861_v22 = vmul.f32 %v5958_v20, %v6268_v30  ;;  %v5928_v30 = vld [vmem:[%s6473_s3 + $0x104] ss:$8 sps:$4 sm:$0xff]  }
 0x28e   :  { %5482 = vmatprep.subr.bf16.mxu1 %v5928_v30 }
 0x28f   :  { %v3862_v23 = vadd.f32 %v3861_v22, %v3860_v18  ;;  %v3866_v24 = vadd.f32 %v3865_v19, %v3864_v21 }
 0x291   :  { %v3869_v25 = vpack.c.bf16 %v3862_v23, %v3862_v23  ;;  %v3867_v26 = vmul.f32 %v3862_v23, %v3862_v23 }
 0x293   :  { %5521 = vmatmul.mubr.bf16.vlgmr.msra.gmra.mrb[44].mxu0 %v3869_v25  ;;  %v3871_v27 = vpack.c.bf16 %v3867_v26, %v3867_v26  ;;  %v3868_v28 = vsub.f32 %v3866_v24, %v3867_v26 }
 0x294   :  { %5540 = vmatprep.mubr.msk.bf16.mxu0 %vm6063_vm0, %v6062_v50  ;;  %5525 = vmatpush3.bf16.msra.mxu0 %v5927_v31 }
 0x295   :  { %4144 = vmatprep.mubr.bf16.mxu1 %v3871_v27  ;;  %v3870_v29 = vpack.c.bf16 %v3868_v28, %v3868_v28  ;;  %5526 = vmatprep.subr.bf16.mxu0 %v6062_v50 }
 0x297   :  { %4145 = vmatmul.mubr.bf16.vlgmr.msra.gmra.mrb[44].mxu1 %v3870_v29 }
 0x298   :  { %5527 = vmatpush3.bf16.msra.mxu0 %v5929_v34  ;;  %5483 = vmatpush3.bf16.msra.mxu1 %v5930_v35 }
 0x299   :  { %5528 = vmatprep.subr.bf16.mxu0 %v6062_v50  ;;  %5484 = vmatprep.subr.bf16.mxu1 %v5931_v36 }
 0x29c   :  { %5529 = vmatpush3.bf16.msra.mxu0 %v5932_v37  ;;  %5485 = vmatpush3.bf16.msra.mxu1 %v5933_v38 }
 0x29d   :  { %5530 = vmatprep.subr.bf16.mxu0 %v6062_v50  ;;  %5486 = vmatprep.subr.bf16.mxu1 %v5934_v39 }
 0x2a0   :  { %5531 = vmatpush3.bf16.msra.mxu0 %v5935_v40  ;;  %5487 = vmatpush3.bf16.msra.mxu1 %v5936_v41  ;;  %v4287_v40 = vsub.s32 4, %v6209_v48 }
 0x2a1   :  { %5532 = vmatprep.subr.bf16.mxu0 %v6062_v50  ;;  %5488 = vmatprep.subr.bf16.mxu1 %v5937_v42  ;;  %v4460_v42 = vsub.s32 5, %v6209_v48 }
 0x2a4   :  { %5533 = vmatpush3.bf16.msra.mxu0 %v5938_v43  ;;  %5489 = vmatpush3.bf16.msra.mxu1 %v5939_v44  ;;  %v4288_v44 = vrot.slane %v6274_v33, %v4287_v40 }
 0x2a5   :  { %5534 = vmatprep.subr.bf16.mxu0 %v6062_v50  ;;  %5490 = vmatprep.subr.bf16.mxu1 %v5940_v45 }
 0x2a8   :  { %5535 = vmatpush3.bf16.msra.mxu0 %v5941_v46  ;;  %5491 = vmatpush3.bf16.msra.mxu1 %v5942_v47 }
 0x2a9   :  { %5536 = vmatprep.subr.bf16.mxu0 %v6062_v50  ;;  %5492 = vmatprep.subr.bf16.mxu1 %v5943_v49  ;;  %v4461_v49 = vrot.slane %v6274_v33, %v4460_v42 }
 0x2ac   :  { %5537 = vmatpush3.bf16.msra.mxu0 %v5944_v51  ;;  %5493 = vmatpush3.bf16.msra.mxu1 %v5945_v52 }
 0x2ad   :  { %5538 = vmatprep.subr.bf16.mxu0 %v6062_v50  ;;  %5494 = vmatprep.subr.bf16.mxu1 %v5946_v54  ;;  %v3891_v50 = vrot.slane %v6274_v33, %v3890_v59 }
 0x2b0   :  { %5539 = vmatpush3.bf16.msra.mxu0 %v5947_v55  ;;  %5495 = vmatpush3.bf16.msra.mxu1 %v5948_v56 }
 0x2b1   :  { %5496 = vmatprep.subr.bf16.mxu1 %v5949_v57 }
 0x2b4   :  { %5497 = vmatpush3.bf16.msra.mxu1 %v5950_v58 }
 0x366   :  { %v3974_v60 = vpop.f32.mrb[44].mxu0 }
 0x367   :  { %v5522_v62 = vpop.f32.mrb[45].mxu0  ;;  %v3975_v5 = vadd.f32 %v3974_v60, %v3891_v50 }
 0x368   :  { %v3977_v63 = vpop.f32.mrb[46].mxu0 }
 0x369   :  { %v5523_v0 = vpop.f32.mrb[47].mxu0  ;;  %v4163_v9 = vmul.f32 %v3975_v5, %v3975_v5  ;;  %v4155_v12 = vmul.f32 1.5957692, %v3975_v5 }
 0x36a   :  { %v5467_v1 = vpop.f32.mrb[44].mxu1 }
 0x36b   :  { %v5468_v3 = vpop.f32.mrb[45].mxu1  ;;  %v4164_v14 = vmul.f32 -0.5, %v4163_v9 }
 0x36c   :  { %v5469_v6 = vadd.f32 %v5468_v3, %v5467_v1  ;;  %v5470_v7 = vpop.f32.mrb[46].mxu1 }
 0x36d   :  { %v5471_v4 = vpop.f32.mrb[47].mxu1 }
 0x36e   :  { %v4147_v8 = vadd.f32 %v5469_v6, %v4015_v2 }
 0x370   :  { %v4152_v10 = vmax.f32 %v4147_v8, 1e-06 }
 0x372   :  { %5959 = vrsqrt.f32 %v4152_v10  ;;  %v4172_v11 = vadd.f32 %v4163_v9, %v4152_v10 }
 0x37c   :  { %v5960_v13 = vpop.eup %5959 }
 0x37d   :  { %v4156_v15 = vmul.f32 %v5960_v13, %v4155_v12  ;;  %v4165_v16 = vmul.f32 %v5960_v13, %v5960_v13  ;;  %v4154_v21 = vmul.f32 %v5960_v13, %v4152_v10 }
 0x37f   :  { %v4157_v17 = vsub.f32 0.0, %v4156_v15  ;;  %v4166_v18 = vmul.f32 %v4165_v16, %v4164_v14  ;;  %v4162_v23 = vmul.f32 0.3989423, %v4154_v21  ;;  %v4505_v15 = vsub.s32 7, %v6209_v48  ;;  %v50_v16 = vld [vmem:[%s6474_s4 + $0x8] sm:$0xff]  ;;  %s6064_s4 = smov 127  }
 0x380   :  { %v4511_v21 = vrot.slane %v50_v16, %v493_v53 }
 0x381   :  { %v4158_v19 = vmul.f32 1.442695, %v4157_v17  ;;  %v4167_v20 = vmul.f32 1.442695, %v4166_v18 }
 0x383   :  { %5961 = vpow2.f32 %v4158_v19 }
 0x384   :  { %5963 = vpow2.f32 %v4167_v20  ;;  %v4506_v20 = vrot.slane %v6274_v33, %v4505_v15 }
 0x38d   :  { %v5962_v22 = vpop.eup %5961 }
 0x38e   :  { %v5964_v24 = vpop.eup %5963  ;;  %v4160_v25 = vadd.f32 1.0, %v5962_v22  ;;  %v4491_v22 = vsub.s32 6, %v6209_v48 }
 0x38f   :  { %v4169_v26 = vmul.f32 %v5964_v24, %v4162_v23 }
 0x390   :  { %5965 = vrcp.f32 %v4160_v25 }
 0x391   :  { %v4174_v27 = vmul.f32 %v4169_v26, %v3975_v5 }
 0x39a   :  { %v5966_v28 = vpop.eup %5965 }
 0x39b   :  { %v4173_v29 = vmul.f32 %v5966_v28, %v4172_v11  ;;  %v4170_v31 = vmul.f32 %v5966_v28, %v3975_v5 }
 0x39d   :  { %v4171_v30 = vadd.f32 %v4170_v31, %v4169_v26  ;;  %v4175_v34 = vadd.f32 %v4174_v27, %v4173_v29  ;;  %v4492_v26 = vrot.slane %v6274_v33, %v4491_v22 }
 0x39f   :  { %v4178_v35 = vpack.c.bf16 %v4171_v30, %v4171_v30  ;;  %v4176_v36 = vmul.f32 %v4171_v30, %v4171_v30  ;;  %v4501_v30 = vrot.slane %v50_v16, %v2345_v32 }
 0x3a1   :  { %5541 = vmatmul.mubr.bf16.vlgmr.msra.gmra.mrb[48].mxu0 %v4178_v35  ;;  %v4180_v37 = vpack.c.bf16 %v4176_v36, %v4176_v36  ;;  %v4177_v38 = vsub.f32 %v4175_v34, %v4176_v36 }
 0x3a3   :  { %4450 = vmatprep.mubr.bf16.mxu1 %v4180_v37  ;;  %v4179_v39 = vpack.c.bf16 %v4177_v38, %v4177_v38 }
 0x3a5   :  { %4451 = vmatmul.mubr.bf16.vlgmr.msra.gmra.mrb[48].mxu1 %v4179_v39 }
 0x474   :  { %v4279_v41 = vpop.f32.mrb[48].mxu0 }
 0x475   :  { %v5542_v43 = vpop.f32.mrb[49].mxu0  ;;  %v4289_v52 = vadd.f32 %v4288_v44, %v4279_v41 }
 0x476   :  { %v4282_v45 = vpop.f32.mrb[50].mxu0 }
 0x477   :  { %v5543_v46 = vpop.f32.mrb[51].mxu0  ;;  %v4474_v58 = vmul.f32 %v4289_v52, %v4289_v52  ;;  %v4466_v61 = vmul.f32 1.5957692, %v4289_v52 }
 0x478   :  { %v5498_v47 = vpop.f32.mrb[48].mxu1 }
 0x479   :  { %v5499_v51 = vpop.f32.mrb[49].mxu1  ;;  %v4475_v50 = vmul.f32 -0.5, %v4474_v58 }
 0x47a   :  { %v5500_v54 = vadd.f32 %v5499_v51, %v5498_v47  ;;  %v5501_v55 = vpop.f32.mrb[50].mxu1 }
 0x47b   :  { %v5502_v56 = vpop.f32.mrb[51].mxu1 }
 0x47c   :  { %v4462_v57 = vadd.f32 %v5500_v54, %v4461_v49 }
 0x47e   :  { %v4463_v59 = vmax.f32 %v4462_v57, 1e-06 }
 0x480   :  { %5967 = vrsqrt.f32 %v4463_v59  ;;  %v4483_v60 = vadd.f32 %v4474_v58, %v4463_v59 }
 0x48a   :  { %v5968_v62 = vpop.eup %5967 }
 0x48b   :  { %v4467_v63 = vmul.f32 %v5968_v62, %v4466_v61  ;;  %v4476_v0 = vmul.f32 %v5968_v62, %v5968_v62  ;;  %v4465_v6 = vmul.f32 %v5968_v62, %v4463_v59 }
 0x48d   :  { %v4468_v1 = vsub.f32 0.0, %v4467_v63  ;;  %v4477_v2 = vmul.f32 %v4476_v0, %v4475_v50  ;;  %v4473_v4 = vmul.f32 0.3989423, %v4465_v6 }
 0x48f   :  { %v4469_v3 = vmul.f32 1.442695, %v4468_v1  ;;  %v4478_v5 = vmul.f32 1.442695, %v4477_v2 }
 0x491   :  { %5969 = vpow2.f32 %v4469_v3 }
 0x492   :  { %5971 = vpow2.f32 %v4478_v5 }
 0x49b   :  { %v5970_v7 = vpop.eup %5969 }
 0x49c   :  { %v5972_v8 = vpop.eup %5971  ;;  %v4471_v9 = vadd.f32 1.0, %v5970_v7 }
 0x49d   :  { %v4480_v10 = vmul.f32 %v5972_v8, %v4473_v4 }
 0x49e   :  { %5973 = vrcp.f32 %v4471_v9 }
 0x49f   :  { %v4485_v11 = vmul.f32 %v4480_v10, %v4289_v52 }
 0x4a8   :  { %v5974_v12 = vpop.eup %5973 }
 0x4a9   :  { %v4484_v13 = vmul.f32 %v5974_v12, %v4483_v60  ;;  %v4481_v14 = vmul.f32 %v5974_v12, %v4289_v52 }
 0x4ab   :  { %v4482_v17 = vadd.f32 %v4481_v14, %v4480_v10  ;;  %v4486_v18 = vadd.f32 %v4485_v11, %v4484_v13 }
 0x4ad   :  { %v4487_v19 = vmul.f32 %v4482_v17, %v4482_v17  ;;  %v4493_v29 = vmul.f32 %v4492_v26, %v4482_v17 }
 0x4af   :  { %v4488_v23 = vsub.f32 %v4486_v18, %v4487_v19  ;;  %v4512_v25 = vmul.f32 %v4511_v21, %v4487_v19  ;;  %v4495_v31 = vsel %vm4494_vm1, %v4493_v29, 0.0 }
 0x4b1   :  { %v4507_v24 = vmul.f32 %v4506_v20, %v4488_v23 }
 0x4b3   :  { %v4513_v27 = vadd.f32 %v4512_v25, %v4507_v24 }
 0x4b5   :  { %v4514_v28 = vsel %vm4494_vm1, %v4513_v27, 0.0 }
 0x4b6   :  { %4515 = vadd.xlane.f32.xlu0 %v4514_v28 }
 0x4ba   :  { %4496 = vadd.xlane.f32.xlu0 %v4495_v31 }
 0x543   :  { %v4516_v34 = vpop.xlane.xlu0 %4515 }
 0x544   :  { %v4517_v35 = vadd.f32 %v4516_v34, %v4501_v30 }
 0x546   :  { %v4518_v53 = vmul.f32 0.39269906, %v4517_v35  ;;  %v4533_v36 = vmul.f32 0.5390121, %v4517_v35 }
 0x547   :  { %v4497_v40 = vpop.xlane.xlu0 %4496 }
 0x548   :  { %v4519_v37 = vadd.f32 1.0, %v4518_v53  ;;  %v4534_v38 = vadd.f32 1.0, %v4533_v36  ;;  %v4502_v41 = vadd.f32 %v4501_v30, %v4497_v40 }
 0x54a   :  { %5975 = vrsqrt.f32 %v4519_v37  ;;  %v4531_v42 = vadd.f32 -0.8813736, %v4502_v41 }
 0x54b   :  { %5977 = vrsqrt.f32 %v4534_v38 }
 0x54c   :  { %v4532_v32 = vmul.f32 1.1715729, %v4531_v42 }
 0x554   :  { %v5976_v39 = vpop.eup %5975 }
 0x555   :  { %4522 = vrot.lane.b32.xlu1 %v5976_v39, %s6064_s4  ;;  %v5978_v33 = vpop.eup %5977 }
 0x559   :  { %4537 = vrot.lane.b32.xlu1 %v5978_v33, %s6064_s4 }
 0x5c7   :  { %v4523_v43 = vpop.permute.xlu1 %4522 }
 0x5c8   :  { %v4525_v44 = vmul.f32 %v4523_v43, %v4502_v41 }
 0x5ca   :  { %v4526_v48 = vsub.f32 0.0, %v4525_v44 }
 0x5cb   :  { %v4538_v45 = vpop.permute.xlu1 %4537 }
 0x5cc   :  { %v4527_v46 = vmul.f32 1.442695, %v4526_v48  ;;  %v4540_v47 = vmul.f32 %v4538_v45, %v4532_v32 }
 0x5ce   :  { %5979 = vpow2.f32 %v4527_v46  ;;  %v4541_v49 = vsub.f32 0.0, %v4540_v47 }
 0x5d0   :  { %v4542_v51 = vmul.f32 1.442695, %v4541_v49 }
 0x5d2   :  { %5981 = vpow2.f32 %v4542_v51 }
 0x5d8   :  { %v5980_v52 = vpop.eup %5979 }
 0x5d9   :  { %v4529_v54 = vadd.f32 1.0, %v5980_v52 }
 0x5db   :  { %5983 = vrcp.f32 %v4529_v54 }
 0x5dc   :  { %v5982_v55 = vpop.eup %5981 }
 0x5dd   :  { %v4544_v56 = vadd.f32 1.0, %v5982_v55 }
 0x5df   :  { %5985 = vrcp.f32 %v4544_v56 }
 0x5e5   :  { %v5984_v57 = vpop.eup %5983 }
 0x5e6   :  { %v4546_v58 = vmul.f32 %v5984_v57, %v5984_v57 }
 0x5e9   :  { %v5986_v59 = vpop.eup %5985 }
 0x5ea   :  { %v4547_v60 = vsub.f32 %v5986_v59, %v4546_v58 }
 0x5ec   :  { %v4548_v61 = vmul.f32 0.5, %v4547_v60 }
 0x5ee   :  { %v4549_v62 = vadd.f32 %v5984_v57, %v4548_v61 }
 0x5f0   :  { %4551 = vst.msk [vmem:[%s6475_s5] sm:$0xff] %vm4550_vm2, %v4549_v62 }
 0x5f1   :  { %4556 = vsyncpa [#allocation3], 1 }
 0x5f2   :  { %4557 = vsyncpa [#allocation5], 1 }

</bundles_post_ra>
